<compile_context>
chip_gen: v7x
topology: tpu7x:2x2x1
jax: 0.10.0
libtpu: 0.0.40
codegen_flags: <defaults>
</compile_context>

<pallas_src>
import numpy as np
import jax
import jax.numpy as jnp
from jax.experimental import pallas as pl
from jax.experimental.pallas import tpu as pltpu

# ----------------------------- hyper-parameters ------------------------------
SAMPLE_RATE = 16000
WINDOW_SIZE = 0.025
WINDOW_STRIDE = 0.01
N_FFT = 512
PREEMPH = 0.97
NFILT = 80
LOWFREQ = 0
LOG_GUARD = 2.0 ** (-24)
PAD_VALUE = 0.0

WIN_LEN = int(WINDOW_SIZE * SAMPLE_RATE)      # 400
HOP = int(WINDOW_STRIDE * SAMPLE_RATE)        # 160
N_FREQ = N_FFT // 2 + 1                       # 257


def _round_up(x, m):
    return ((x + m - 1) // m) * m


F_PAD = _round_up(N_FREQ, 128)                # 384 (re / im lane-padded width)
NFILT_PAD = _round_up(NFILT, 128)             # 128
N_HOP_BLOCKS = 4                              # 512 = 3*160 + 32 -> 4 hop-aligned weight blocks
MAX_T_TILE = 512                              # frames per kernel tile (multiple of 8)


# ------------------- deterministic "parameters" (numpy) ----------------------
def _slaney_mel_filterbank(sr, n_fft, n_mels, fmin, fmax):
    """Re-implementation of librosa.filters.mel(norm='slaney', htk=False)."""
    def hz_to_mel(f):
        f = np.asarray(f, dtype=np.float64)
        f_sp = 200.0 / 3.0
        mels = f / f_sp
        min_log_hz = 1000.0
        min_log_mel = min_log_hz / f_sp
        logstep = np.log(6.4) / 27.0
        return np.where(f >= min_log_hz,
                        min_log_mel + np.log(np.maximum(f, 1e-10) / min_log_hz) / logstep,
                        mels)

    def mel_to_hz(m):
        m = np.asarray(m, dtype=np.float64)
        f_sp = 200.0 / 3.0
        freqs = f_sp * m
        min_log_hz = 1000.0
        min_log_mel = min_log_hz / f_sp
        logstep = np.log(6.4) / 27.0
        return np.where(m >= min_log_mel,
                        min_log_hz * np.exp(logstep * (m - min_log_mel)),
                        freqs)

    n_freq = n_fft // 2 + 1
    fftfreqs = np.linspace(0.0, sr / 2.0, n_freq)
    mel_f = mel_to_hz(np.linspace(hz_to_mel(fmin), hz_to_mel(fmax), n_mels + 2))
    fdiff = np.diff(mel_f)
    ramps = mel_f[:, None] - fftfreqs[None, :]
    weights = np.zeros((n_mels, n_freq), dtype=np.float64)
    for i in range(n_mels):
        lower = -ramps[i] / fdiff[i]
        upper = ramps[i + 2] / fdiff[i + 1]
        weights[i] = np.maximum(0.0, np.minimum(lower, upper))
    enorm = 2.0 / (mel_f[2:n_mels + 2] - mel_f[:n_mels])          # slaney norm
    weights *= enorm[:, None]
    return weights.astype(np.float32)


def _build_constants():
    # hann window (periodic=False == torch.hann_window(400, periodic=False)),
    # centered inside the n_fft frame like torch.stft does for win_length < n_fft.
    win = np.zeros(N_FFT, dtype=np.float64)
    off = (N_FFT - WIN_LEN) // 2
    win[off:off + WIN_LEN] = np.hanning(WIN_LEN)

    n = np.arange(N_FFT)[:, None].astype(np.float64)
    k = np.arange(N_FREQ)[None, :].astype(np.float64)
    ang = 2.0 * np.pi * n * k / N_FFT
    wc = win[:, None] * np.cos(ang)                               # (512, 257) real part
    ws = -win[:, None] * np.sin(ang)                              # (512, 257) imag part
    wc = np.pad(wc, ((0, 0), (0, F_PAD - N_FREQ)))
    ws = np.pad(ws, ((0, 0), (0, F_PAD - N_FREQ)))
    wcs = np.concatenate([wc, ws], axis=1)                        # (512, 768) = [re | im]

    # split the 512-row DFT weight into 4 hop-aligned (160, 768) blocks; the last block
    # only uses its first 32 rows (512 - 3*160), the remaining rows are zero so the
    # kernel can matmul against full 160-sample hop rows.
    wcs4 = np.pad(wcs, ((0, N_HOP_BLOCKS * HOP - N_FFT), (0, 0)))
    wcs4 = wcs4.reshape(N_HOP_BLOCKS, HOP, 2 * F_PAD)

    fb = _slaney_mel_filterbank(SAMPLE_RATE, N_FFT, NFILT, LOWFREQ, SAMPLE_RATE / 2.0)
    fbt = np.pad(fb.T, ((0, F_PAD - N_FREQ), (0, NFILT_PAD - NFILT)))  # (384, 128)

    return (jnp.asarray(wcs4, dtype=jnp.bfloat16),   # bf16 MXU inputs (perf review)
            jnp.asarray(fbt, dtype=jnp.float32))     # small mel matmul stays f32


W4, FBT = _build_constants()


# ------------------------------ Pallas kernel ---------------------------------
def mel_kernel(seq_ref, hop_ref, halo_ref, w_ref, fbt_ref, o_ref, hops_scr):
    """One (batch, frame-tile) grid step: windowed DFT + |.|^2 + mel + log + length mask."""
    b = pl.program_id(0)
    t = pl.program_id(1)
    t_tile = hop_ref.shape[1]
    seq = seq_ref[b]                       # valid frame count for this batch element
    t0 = t * t_tile                        # first frame index of this tile

    @pl.when(t0 >= seq)                    # tile entirely past the utterance: skip all compute
    def _():
        o_ref[0] = jnp.full(o_ref.shape[1:], PAD_VALUE, dtype=o_ref.dtype)

    @pl.when(t0 < seq)
    def _():
        # Stage the contiguous hop rows (tile + 8-row halo) once in VMEM scratch.
        hops_scr[0:t_tile, :] = hop_ref[0]
        hops_scr[t_tile:t_tile + 8, :] = halo_ref[0]

        # Windowed DFT. Frame i spans hop rows i..i+3 (512 = 3*160 + 32), so the
        # (t_tile, 512) frame matrix is never built: accumulate 4 shifted
        # (t_tile,160) x (160,768) bf16 matmuls against zero-padded weight blocks.
        acc = jnp.zeros((t_tile, 2 * F_PAD), jnp.float32)
        for k in range(N_HOP_BLOCKS):
            v = hops_scr[pl.ds(k, t_tile), :].astype(jnp.bfloat16)
            acc = acc + jnp.dot(v, w_ref[k], preferred_element_type=jnp.float32)

        re = acc[:, :F_PAD]                                       # 128-aligned lane slices
        im = acc[:, F_PAD:]
        pw = re * re + im * im                                    # |STFT|^2, mag_power=2 (no sqrt)
        mel = jnp.dot(pw, fbt_ref[...], preferred_element_type=jnp.float32)   # (t_tile, 128)
        logmel = jnp.log(mel + LOG_GUARD)

        t_idx = t0 + jax.lax.broadcasted_iota(jnp.int32, logmel.shape, 0)
        o_ref[0] = jnp.where(t_idx >= seq, PAD_VALUE, logmel)


# -------------------------------- wrapper -------------------------------------
def preprocess(x, seq_len):
    """x: (B, N) float32 waveform; seq_len: (B,) int32 valid-sample counts.
    Returns (mel, seq_frames) matching Preprocessor.forward: mel is (B, NFILT, T)."""
    x = x.astype(jnp.float32)
    B, N = x.shape

    # get_seq_len: (len + 2*(n_fft//2) - n_fft) // hop + 1 == len // hop + 1
    seq_frames = (seq_len.astype(jnp.int32) // HOP) + 1

    # --- JAX glue: pre-emphasis, reflect pad (torch.stft center=True) and the
    #     non-overlapping hop reshape.  XLA fuses these into one pass over the
    #     waveform; no overlapping frame tensor is ever written to HBM. ---
    y = jnp.concatenate([x[:, :1], x[:, 1:] - PREEMPH * x[:, :-1]], axis=1)
    pad = N_FFT // 2
    xp = jnp.pad(y, ((0, 0), (pad, pad)), mode="reflect")

    T = N // HOP + 1                                   # STFT frame count
    t_tile = min(MAX_T_TILE, _round_up(T, 8))
    T_pad = _round_up(T, t_tile)
    num_t_tiles = T_pad // t_tile
    n_hops = T_pad + t_tile                            # + halo / alignment padding
    xp = jnp.pad(xp, ((0, 0), (0, n_hops * HOP - xp.shape[1])))
    hops = xp.reshape(B, n_hops, HOP)                  # (B, n_hops, 160), free reshape

    out = pl.pallas_call(
        mel_kernel,
        out_shape=jax.ShapeDtypeStruct((B, T_pad, NFILT_PAD), jnp.float32),
        grid_spec=pltpu.PrefetchScalarGridSpec(
            num_scalar_prefetch=1,
            grid=(B, num_t_tiles),
            in_specs=[
                # hop rows for this frame tile
                pl.BlockSpec((1, t_tile, HOP), lambda b, t, seq: (b, t, 0)),
                # 8-row halo (the 3 extra hop rows the last frames of the tile need)
                pl.BlockSpec((1, 8, HOP),
                             lambda b, t, seq: (b, (t + 1) * (t_tile // 8), 0)),
                # DFT weights (4 hop-aligned blocks, bf16) and mel filterbank (f32)
                pl.BlockSpec((N_HOP_BLOCKS, HOP, 2 * F_PAD), lambda b, t, seq: (0, 0, 0)),
                pl.BlockSpec((F_PAD, NFILT_PAD), lambda b, t, seq: (0, 0)),
            ],
            out_specs=pl.BlockSpec((1, t_tile, NFILT_PAD), lambda b, t, seq: (b, t, 0)),
            scratch_shapes=[pltpu.VMEM((t_tile + 8, HOP), jnp.float32)],
        ),
        compiler_params=pltpu.CompilerParams(
            dimension_semantics=("parallel", "parallel")),
    )(seq_frames, hops, hops, W4, FBT)

    # un-pad + (0,2,1) transpose: one fused XLA copy (output blocks already 128-lane dense)
    mel = jnp.transpose(out[:, :T, :NFILT], (0, 2, 1))            # (B, NFILT, T)
    return mel, seq_frames


# --------------------------------- main ----------------------------------------
if __name__ == "__main__":
    key = jax.random.PRNGKey(0)
    B = 2
    num_samples = 1600                       # 0.1 s @ 16 kHz -> 11 frames
    x = 0.1 * jax.random.normal(key, (B, num_samples), dtype=jnp.float32)
    seq_len = jnp.array([1600, 1200], dtype=jnp.int32)

    mel, out_seq = jax.jit(preprocess)(x, seq_len)
    mel, out_seq = jax.block_until_ready((mel, out_seq))

    expected_T = num_samples // HOP + 1
    assert mel.shape == (B, NFILT, expected_T), mel.shape
    assert out_seq.shape == (B,), out_seq.shape
    assert bool(jnp.all(jnp.isfinite(mel)))
    # frames beyond per-batch seq_len must equal pad_value
    assert bool(jnp.all(mel[1, :, int(out_seq[1]):] == PAD_VALUE))
    print("KERNEL_OK")
</pallas_src>

<mosaic_0001>
module attributes {stable_mosaic.version = 11 : i64} {
  func.func @mel_kernel(%arg0: i32, %arg1: i32, %arg2: memref<2xi32, #tpu.memory_space<smem>>, %arg3: memref<1x16x160xf32, #tpu.memory_space<vmem>>, %arg4: memref<1x8x160xf32, #tpu.memory_space<vmem>>, %arg5: memref<4x160x768xbf16, #tpu.memory_space<vmem>>, %arg6: memref<384x128xf32, #tpu.memory_space<vmem>>, %arg7: memref<1x16x128xf32, #tpu.memory_space<vmem>>, %arg8: memref<24x160xf32, #tpu.memory_space<vmem>>) attributes {dimension_semantics = [#tpu.dimension_semantics<parallel>, #tpu.dimension_semantics<parallel>], iteration_bounds = array<i64: 2, 1>, scalar_prefetch = 1 : i64, scratch_operands = 1 : i64, tpu.core_type = #tpu.core_type<tc>, window_params = [{transform_indices = @transform_0, window_bounds = array<i64: 1, 16, 160>}, {transform_indices = @transform_1, window_bounds = array<i64: 1, 8, 160>}, {pipeline_mode = #tpu.pipeline_mode<synchronous>, transform_indices = @transform_2, window_bounds = array<i64: 4, 160, 768>}, {pipeline_mode = #tpu.pipeline_mode<synchronous>, transform_indices = @transform_3, window_bounds = array<i64: 384, 128>}, {transform_indices = @transform_4, window_bounds = array<i64: 1, 16, 128>}]} {
    %0 = arith.index_cast %arg0 : i32 to index
    %1 = memref.load %arg2[%0] : memref<2xi32, #tpu.memory_space<smem>>
    %c16_i32 = arith.constant 16 : i32
    %2 = arith.muli %arg1, %c16_i32 : i32
    %3 = arith.cmpi sge, %2, %1 : i32
    %4 = arith.extui %3 : i1 to i32
    %c0_i32 = arith.constant 0 : i32
    %5 = arith.cmpi ne, %4, %c0_i32 : i32
    scf.if %5 {
      %cst = arith.constant 0.000000e+00 : f32
      %9 = vector.broadcast %cst : f32 to vector<16x128xf32>
      %c0 = arith.constant 0 : index
      %c0_1 = arith.constant 0 : index
      %c0_2 = arith.constant 0 : index
      %10 = vector.load %arg7[%c0, %c0_1, %c0_2] : memref<1x16x128xf32, #tpu.memory_space<vmem>>, vector<1x16x128xf32>
      %11 = vector.shape_cast %10 : vector<1x16x128xf32> to vector<16x128xf32>
      %12 = vector.shape_cast %9 : vector<16x128xf32> to vector<1x16x128xf32>
      tpu.vector_store %arg7[%c0, %c0_1, %c0_2], %12 {strides = array<i32>} : memref<1x16x128xf32, #tpu.memory_space<vmem>>, vector<1x16x128xf32>,
    } else {
    }
    %6 = arith.cmpi slt, %2, %1 : i32
    %7 = arith.extui %6 : i1 to i32
    %c0_i32_0 = arith.constant 0 : i32
    %8 = arith.cmpi ne, %7, %c0_i32_0 : i32
    scf.if %8 {
      %c0 = arith.constant 0 : index
      %c0_1 = arith.constant 0 : index
      %c0_2 = arith.constant 0 : index
      %9 = vector.load %arg3[%c0, %c0_1, %c0_2] : memref<1x16x160xf32, #tpu.memory_space<vmem>>, vector<1x16x160xf32>
      %10 = vector.shape_cast %9 : vector<1x16x160xf32> to vector<16x160xf32>
      %c0_3 = arith.constant 0 : index
      %c0_4 = arith.constant 0 : index
      %11 = vector.load %arg8[%c0_3, %c0_4] : memref<24x160xf32, #tpu.memory_space<vmem>>, vector<16x160xf32>
      tpu.vector_store %arg8[%c0_3, %c0_4], %10 {strides = array<i32>} : memref<24x160xf32, #tpu.memory_space<vmem>>, vector<16x160xf32>,
      %c0_5 = arith.constant 0 : index
      %c0_6 = arith.constant 0 : index
      %c0_7 = arith.constant 0 : index
      %12 = vector.load %arg4[%c0_5, %c0_6, %c0_7] : memref<1x8x160xf32, #tpu.memory_space<vmem>>, vector<1x8x160xf32>
      %13 = vector.shape_cast %12 : vector<1x8x160xf32> to vector<8x160xf32>
      %c16 = arith.constant 16 : index
      %c0_8 = arith.constant 0 : index
      %14 = vector.load %arg8[%c16, %c0_8] : memref<24x160xf32, #tpu.memory_space<vmem>>, vector<8x160xf32>
      tpu.vector_store %arg8[%c16, %c0_8], %13 {strides = array<i32>} : memref<24x160xf32, #tpu.memory_space<vmem>>, vector<8x160xf32>,
      %cst = arith.constant 0.000000e+00 : f32
      %15 = vector.broadcast %cst : f32 to vector<16x768xf32>
      %c0_9 = arith.constant 0 : index
      %c0_10 = arith.constant 0 : index
      %16 = vector.load %arg8[%c0_9, %c0_10] : memref<24x160xf32, #tpu.memory_space<vmem>>, vector<16x160xf32>
      %17 = arith.truncf %16 : vector<16x160xf32> to vector<16x160xbf16>
      %c0_11 = arith.constant 0 : index
      %c0_12 = arith.constant 0 : index
      %c0_13 = arith.constant 0 : index
      %18 = vector.load %arg5[%c0_11, %c0_12, %c0_13] : memref<4x160x768xbf16, #tpu.memory_space<vmem>>, vector<1x160x768xbf16>
      %19 = vector.shape_cast %18 : vector<1x160x768xbf16> to vector<160x768xbf16>
      %cst_14 = arith.constant dense<0.000000e+00> : vector<16x768xf32>
      %20 = tpu.matmul %17, %19, %cst_14 {dimension_numbers = #tpu.dot_dimension_numbers<[1], [0], [0], [1], [0, 0, 1, 1], [], []>} : vector<16x160xbf16>, vector<160x768xbf16>, vector<16x768xf32> -> vector<16x768xf32>
      %21 = arith.addf %15, %20 : vector<16x768xf32>
      %c1 = arith.constant 1 : index
      %c0_15 = arith.constant 0 : index
      %22 = vector.load %arg8[%c1, %c0_15] : memref<24x160xf32, #tpu.memory_space<vmem>>, vector<16x160xf32>
      %23 = arith.truncf %22 : vector<16x160xf32> to vector<16x160xbf16>
      %c1_16 = arith.constant 1 : index
      %c0_17 = arith.constant 0 : index
      %c0_18 = arith.constant 0 : index
      %24 = vector.load %arg5[%c1_16, %c0_17, %c0_18] : memref<4x160x768xbf16, #tpu.memory_space<vmem>>, vector<1x160x768xbf16>
      %25 = vector.shape_cast %24 : vector<1x160x768xbf16> to vector<160x768xbf16>
      %cst_19 = arith.constant dense<0.000000e+00> : vector<16x768xf32>
      %26 = tpu.matmul %23, %25, %cst_19 {dimension_numbers = #tpu.dot_dimension_numbers<[1], [0], [0], [1], [0, 0, 1, 1], [], []>} : vector<16x160xbf16>, vector<160x768xbf16>, vector<16x768xf32> -> vector<16x768xf32>
      %27 = arith.addf %21, %26 : vector<16x768xf32>
      %c2 = arith.constant 2 : index
      %c0_20 = arith.constant 0 : index
      %28 = vector.load %arg8[%c2, %c0_20] : memref<24x160xf32, #tpu.memory_space<vmem>>, vector<16x160xf32>
      %29 = arith.truncf %28 : vector<16x160xf32> to vector<16x160xbf16>
      %c2_21 = arith.constant 2 : index
      %c0_22 = arith.constant 0 : index
      %c0_23 = arith.constant 0 : index
      %30 = vector.load %arg5[%c2_21, %c0_22, %c0_23] : memref<4x160x768xbf16, #tpu.memory_space<vmem>>, vector<1x160x768xbf16>
      %31 = vector.shape_cast %30 : vector<1x160x768xbf16> to vector<160x768xbf16>
      %cst_24 = arith.constant dense<0.000000e+00> : vector<16x768xf32>
      %32 = tpu.matmul %29, %31, %cst_24 {dimension_numbers = #tpu.dot_dimension_numbers<[1], [0], [0], [1], [0, 0, 1, 1], [], []>} : vector<16x160xbf16>, vector<160x768xbf16>, vector<16x768xf32> -> vector<16x768xf32>
      %33 = arith.addf %27, %32 : vector<16x768xf32>
      %c3 = arith.constant 3 : index
      %c0_25 = arith.constant 0 : index
      %34 = vector.load %arg8[%c3, %c0_25] : memref<24x160xf32, #tpu.memory_space<vmem>>, vector<16x160xf32>
      %35 = arith.truncf %34 : vector<16x160xf32> to vector<16x160xbf16>
      %c3_26 = arith.constant 3 : index
      %c0_27 = arith.constant 0 : index
      %c0_28 = arith.constant 0 : index
      %36 = vector.load %arg5[%c3_26, %c0_27, %c0_28] : memref<4x160x768xbf16, #tpu.memory_space<vmem>>, vector<1x160x768xbf16>
      %37 = vector.shape_cast %36 : vector<1x160x768xbf16> to vector<160x768xbf16>
      %cst_29 = arith.constant dense<0.000000e+00> : vector<16x768xf32>
      %38 = tpu.matmul %35, %37, %cst_29 {dimension_numbers = #tpu.dot_dimension_numbers<[1], [0], [0], [1], [0, 0, 1, 1], [], []>} : vector<16x160xbf16>, vector<160x768xbf16>, vector<16x768xf32> -> vector<16x768xf32>
      %39 = arith.addf %33, %38 : vector<16x768xf32>
      %40 = vector.extract_strided_slice %39 {offsets = [0, 0], sizes = [16, 384], strides = [1, 1]} : vector<16x768xf32> to vector<16x384xf32>
      %41 = vector.extract_strided_slice %39 {offsets = [0, 384], sizes = [16, 384], strides = [1, 1]} : vector<16x768xf32> to vector<16x384xf32>
      %42 = arith.mulf %40, %40 : vector<16x384xf32>
      %43 = arith.mulf %41, %41 : vector<16x384xf32>
      %44 = arith.addf %42, %43 : vector<16x384xf32>
      %c0_30 = arith.constant 0 : index
      %c0_31 = arith.constant 0 : index
      %45 = vector.load %arg6[%c0_30, %c0_31] : memref<384x128xf32, #tpu.memory_space<vmem>>, vector<384x128xf32>
      %cst_32 = arith.constant dense<0.000000e+00> : vector<16x128xf32>
      %46 = tpu.matmul %44, %45, %cst_32 {dimension_numbers = #tpu.dot_dimension_numbers<[1], [0], [0], [1], [0, 0, 1, 1], [], []>} : vector<16x384xf32>, vector<384x128xf32>, vector<16x128xf32> -> vector<16x128xf32>
      %cst_33 = arith.constant 5.96046448E-8 : f32
      %47 = vector.broadcast %cst_33 : f32 to vector<16x128xf32>
      %48 = arith.addf %46, %47 : vector<16x128xf32>
      %49 = math.log %48 : vector<16x128xf32>
      %50 = tpu.iota {dimensions = array<i32: 0>} : vector<16x128xi32>
      %51 = vector.broadcast %2 : i32 to vector<16x128xi32>
      %52 = arith.addi %51, %50 : vector<16x128xi32>
      %53 = vector.broadcast %1 : i32 to vector<16x128xi32>
      %54 = arith.cmpi sge, %52, %53 : vector<16x128xi32>
      %cst_34 = arith.constant 0.000000e+00 : f32
      %55 = vector.broadcast %cst_34 : f32 to vector<16x128xf32>
      %56 = arith.select %54, %55, %49 : vector<16x128xi1>, vector<16x128xf32>
      %c0_35 = arith.constant 0 : index
      %c0_36 = arith.constant 0 : index
      %c0_37 = arith.constant 0 : index
      %57 = vector.load %arg7[%c0_35, %c0_36, %c0_37] : memref<1x16x128xf32, #tpu.memory_space<vmem>>, vector<1x16x128xf32>
      %58 = vector.shape_cast %57 : vector<1x16x128xf32> to vector<16x128xf32>
      %59 = vector.shape_cast %56 : vector<16x128xf32> to vector<1x16x128xf32>
      tpu.vector_store %arg7[%c0_35, %c0_36, %c0_37], %59 {strides = array<i32>} : memref<1x16x128xf32, #tpu.memory_space<vmem>>, vector<1x16x128xf32>,
    } else {
    }
    return
  }
  func.func @transform_0(%arg0: i32, %arg1: i32, %arg2: memref<2xi32, #tpu.memory_space<smem>>) -> (i32, i32, i32) {
    %c0_i32 = arith.constant 0 : i32
    %c0_i32_0 = arith.constant 0 : i32
    return %arg0, %arg1, %c0_i32 : i32, i32, i32
  }
  func.func @transform_1(%arg0: i32, %arg1: i32, %arg2: memref<2xi32, #tpu.memory_space<smem>>) -> (i32, i32, i32) {
    %c1_i32 = arith.constant 1 : i32
    %0 = arith.addi %arg1, %c1_i32 : i32
    %c2_i32 = arith.constant 2 : i32
    %1 = arith.muli %0, %c2_i32 : i32
    %c0_i32 = arith.constant 0 : i32
    %c0_i32_0 = arith.constant 0 : i32
    return %arg0, %1, %c0_i32 : i32, i32, i32
  }
  func.func @transform_2(%arg0: i32, %arg1: i32, %arg2: memref<2xi32, #tpu.memory_space<smem>>) -> (i32, i32, i32) {
    %c0_i32 = arith.constant 0 : i32
    %c0_i32_0 = arith.constant 0 : i32
    %c0_i32_1 = arith.constant 0 : i32
    %c0_i32_2 = arith.constant 0 : i32
    return %c0_i32, %c0_i32_0, %c0_i32_1 : i32, i32, i32
  }
  func.func @transform_3(%arg0: i32, %arg1: i32, %arg2: memref<2xi32, #tpu.memory_space<smem>>) -> (i32, i32) {
    %c0_i32 = arith.constant 0 : i32
    %c0_i32_0 = arith.constant 0 : i32
    %c0_i32_1 = arith.constant 0 : i32
    return %c0_i32, %c0_i32_0 : i32, i32
  }
  func.func @transform_4(%arg0: i32, %arg1: i32, %arg2: memref<2xi32, #tpu.memory_space<smem>>) -> (i32, i32, i32) {
    %c0_i32 = arith.constant 0 : i32
    %c0_i32_0 = arith.constant 0 : i32
    return %arg0, %arg1, %c0_i32 : i32, i32, i32
  }
}

</mosaic_0001>

<bundles_post_ra>
// kernel: preprocess.1
= control target key start
LH: loop header
LB: loop body
LE: loop exit
PB: predicated region body
PF: predicated region fallthrough
CT: control target
= control target key end

     0   :  { %s4878_s0 = inlined_call_operand.vmem [shape: s32[2], index: 0, kind: input, shape index: {}]   ;;  %s4879_s1 = inlined_call_operand.vmem [shape: f32[2,32,160], index: 1, kind: input, shape index: {}, may-alias: {1,2}]   ;;  %s4880_s2 = inlined_call_operand.vmem [shape: f32[2,32,160], index: 2, kind: input, shape index: {}, may-alias: {1,2}]   ;;  %s4881_s3 = inlined_call_operand.vmem [shape: bf16[4,160,768], index: 3, kind: input, shape index: {}]   ;;  %s4882_s4 = inlined_call_operand.vmem [shape: f32[384,128], index: 4, kind: input, shape index: {}]   ;;  %s4883_s5 = inlined_call_operand.vmem [shape: f32[2,16,128], index: 5, kind: output, shape index: {}]  }
   0x1   :  { %s10_s20 = sshll.u32 %s4878_s0, 4  ;;  %s11_s20 = int_to_ptr.vmem [resolvable:$true] %s10_s20 }
   0x2   :  { %s3800_s21 = scalar_lea.vmem %s11_s20, 16  ;;  %p3805_p1 = scmp.lt.s32.totalorder %s11_s20, %s11_s20 }
   0x3   :  { %p3801_p0 = scmp.ne.s32.totalorder %s11_s20, %s3800_s21  ;;  %p3806_p2 = scmp.lt.s32.totalorder %s3800_s21, %s3800_s21 }
   0x5   :  { %p3807_p3 = por %p3806_p2, %p3805_p1 }
   0x7   :  { %p3808_p4 = pnand %p3807_p3, %p3801_p0 }
   0x9   :  { %3811 = shalt.err (!%p3808_p4)  }
   0xa   :  { %s3838_s22 = smov [#allocation4]  }
   0xb   :  { %13 = dma.vmem_to_smem %s11_s20, 16, %s3838_s22, [#allocation3] }
   0xc   :  { %3824 = dma.done.wait [#allocation3], 16 }
   0xd   :  { %3825 = vsyncadd [#allocation3], 4294967280 }
   0xe   :  { %15 = sfence }
   0xf   :  { %s3873_s23 = smov 0   ;;  %s3875_s24 = smov 0  }
  0x10   :  { %s3877_s25 = smov 0  }
  0x11 LB: > { %s33_s0 = sadd.s32 1, %s3832_s24  ;;  %p2768_p5 = scmp.ge.s32.totalorder %s3836_s25, 1  ;;  %s3836_s25 = sphi %s3877_s25, %s21_s25   ;;  %s3832_s24 = sphi %s3875_s24, %s4885_s24   ;;  %s3828_s23 = sphi %s3873_s23, %s4884_s23  }
  0x12   : > { %p35_p6 = scmp.ge.s32.totalorder %s33_s0, 2  ;;  %p215_p7 = scmp.lt.s32.totalorder %s3836_s25, 3 }
  0x14   : > { %s4887_s0 = smov (%p35_p6, %s33_s0), 0  ;;  %p216_p8 = pnand %p2768_p5, %p215_p7 }
  0x15   : > { %p262_p9 = scmp.lt.s32.totalorder (!%p216_p8), %s3828_s23, 1  ;;  %s3891_s26 = sld [smem:[#allocation4 + %s3828_s23]] (!%p216_p8) }
  0x16   : > { %219 = sbr.rel (%p216_p8) target bundleno = 797 (0x31d), region = 36 }
  0x1b   : > { %p2776_p10 = scmp.gt.s32.totalorder (!%p216_p8), %s3891_s26, 0 }
  0x1d   : > { %s4889_s23 = smov (!%p262_p9, %s3828_s23), 1  ;;  %301 = sbr.rel (%p2776_p10) target bundleno = 36 (0x24), region = 40 }
  0x1e   : > { %s3213_s27 = sshll.u32 %s4889_s23, 6  ;;  %s3216_s28 = sshll.u32 %s4889_s23, 4  ;;  %v3839_v0 = vmov (!%p2776_p10), 0.0  }
  0x1f   : > { %s3896_s6 = scalar_lea.vmem %s4879_s1, %s3213_s27  ;;  %s3215_s7 = sadd.s32 32, %s3213_s27 }
  0x20   : > { %s3901_s10 = scalar_lea.vmem %s4880_s2, %s3215_s7  ;;  %s3906_s13 = scalar_lea.vmem %s4883_s5, %s3216_s28 }
  0x21   : > { %302 = vst [vmem:[%s3906_s13] sm:$0xff] (!%p2776_p10), %v3839_v0  ;;  %303 = vst [vmem:[%s3906_s13 + $0x8] sm:$0xff] (!%p2776_p10), %v3839_v0 }
  0x24 PF: > { %p2778_p11 = scmp.le.s32.totalorder %s3891_s26, 0 }
  0x25   : > { %v3435_v1 = vld [vmem:[%s4881_s3 + $0x1e4] ss:$24 sps:$4 sm:$0xff] (!%p2778_p11)   ;;  %v3437_v2 = vld [vmem:[%s4881_s3 + $0x1f4] ss:$24 sps:$4 sm:$0xff] (!%p2778_p11)   ;;  %v3439_v3 = vld [vmem:[%s4881_s3 + $0x1e0] ss:$24 sps:$4 sm:$0xff] (!%p2778_p11)  }
  0x26   : > { %307 = sbr.rel (%p2778_p11) target bundleno = 797 (0x31d), region = 44  ;;  %785 = vmatprep.subr.bf16.mxu1 (!%p2778_p11), %v3435_v1  ;;  %v3440_v4 = vld [vmem:[%s4881_s3 + $0x1f0] ss:$24 sps:$4 sm:$0xff] (!%p2778_p11)   ;;  %871 = vmatprep.subr.bf16.mxu0 (!%p2778_p11), %v3437_v2  ;;  %v3441_v5 = vld [vmem:[%s4881_s3 + $0x214] ss:$24 sps:$4 sm:$0xff] (!%p2778_p11)   ;;  %vm313_vm0 = vcmask (!%p2778_p11), 261120  }
  0x27   : > { %786 = vmatpush1.bf16.msra.mxu1 (!%p2778_p11), %v3439_v3  ;;  %872 = vmatpush1.bf16.msra.mxu0 (!%p2778_p11), %v3440_v4  ;;  %v3443_v6 = vld [vmem:[%s4881_s3 + $0x224] ss:$24 sps:$4 sm:$0xff] (!%p2778_p11)   ;;  %v3445_v7 = vld [vmem:[%s4881_s3 + $0x210] ss:$24 sps:$4 sm:$0xff] (!%p2778_p11)   ;;  %v3446_v8 = vld [vmem:[%s4881_s3 + $0x220] ss:$24 sps:$4 sm:$0xff] (!%p2778_p11)  }
  0x28   : > { %787 = vmatprep.subr.bf16.mxu1 (!%p2778_p11), %v3441_v5  ;;  %873 = vmatprep.subr.bf16.mxu0 (!%p2778_p11), %v3443_v6  ;;  %v3447_v9 = vld [vmem:[%s4881_s3 + $0x244] ss:$24 sps:$4 sm:$0xff] (!%p2778_p11)   ;;  %v3449_v10 = vld [vmem:[%s4881_s3 + $0x254] ss:$24 sps:$4 sm:$0xff] (!%p2778_p11)   ;;  %v3451_v11 = vld [vmem:[%s4881_s3 + $0x240] ss:$24 sps:$4 sm:$0xff] (!%p2778_p11)  }
  0x29   : > { %v3452_v12 = vld [vmem:[%s4881_s3 + $0x250] ss:$24 sps:$4 sm:$0xff] (!%p2778_p11)   ;;  %v3453_v13 = vld [vmem:[%s4881_s3 + $0x274] ss:$24 sps:$4 sm:$0xff] (!%p2778_p11)   ;;  %v3455_v14 = vld [vmem:[%s4881_s3 + $0x284] ss:$24 sps:$4 sm:$0xff] (!%p2778_p11)  }
  0x2a   : > { %v3457_v15 = vld [vmem:[%s4881_s3 + $0x270] ss:$24 sps:$4 sm:$0xff] (!%p2778_p11)   ;;  %v3458_v16 = vld [vmem:[%s4881_s3 + $0x280] ss:$24 sps:$4 sm:$0xff] (!%p2778_p11)   ;;  %v3459_v17 = vld [vmem:[%s4881_s3 + $0x2a4] ss:$24 sps:$4 sm:$0xff] (!%p2778_p11)  }
  0x2b   : > { %788 = vmatpush1.bf16.msra.mxu1 (!%p2778_p11), %v3445_v7  ;;  %874 = vmatpush1.bf16.msra.mxu0 (!%p2778_p11), %v3446_v8  ;;  %v3461_v18 = vld [vmem:[%s4881_s3 + $0x2b4] ss:$24 sps:$4 sm:$0xff] (!%p2778_p11)   ;;  %v3463_v19 = vld [vmem:[%s4881_s3 + $0x2a0] ss:$24 sps:$4 sm:$0xff] (!%p2778_p11)   ;;  %v3464_v20 = vld [vmem:[%s4881_s3 + $0x2b0] ss:$24 sps:$4 sm:$0xff] (!%p2778_p11)  }
  0x2c   : > { %789 = vmatprep.subr.bf16.mxu1 (!%p2778_p11), %v3447_v9  ;;  %875 = vmatprep.subr.bf16.mxu0 (!%p2778_p11), %v3449_v10  ;;  %v3465_v21 = vld [vmem:[%s4881_s3 + $0x2d4] ss:$24 sps:$4 sm:$0xff] (!%p2778_p11)   ;;  %v3467_v22 = vld [vmem:[%s4881_s3 + $0x2e4] ss:$24 sps:$4 sm:$0xff] (!%p2778_p11)   ;;  %v3469_v23 = vld [vmem:[%s4881_s3 + $0x2d0] ss:$24 sps:$4 sm:$0xff] (!%p2778_p11)  }
  0x2d   : > { %v3470_v24 = vld [vmem:[%s4881_s3 + $0x2e0] ss:$24 sps:$4 sm:$0xff]   ;;  %v3471_v25 = vld [vmem:[%s4881_s3 + $0x304] ss:$24 sps:$4 sm:$0xff]   ;;  %v3473_v26 = vld [vmem:[%s4881_s3 + $0x314] ss:$24 sps:$4 sm:$0xff]  }
  0x2e   : > { %v3475_v27 = vld [vmem:[%s4881_s3 + $0x300] ss:$24 sps:$4 sm:$0xff]   ;;  %v3476_v28 = vld [vmem:[%s4881_s3 + $0x310] ss:$24 sps:$4 sm:$0xff]   ;;  %v3477_v29 = vld [vmem:[%s4881_s3 + $0x334] ss:$24 sps:$4 sm:$0xff]  }
  0x2f   : > { %790 = vmatpush1.bf16.msra.mxu1 %v3451_v11  ;;  %876 = vmatpush1.bf16.msra.mxu0 %v3452_v12  ;;  %v3479_v30 = vld [vmem:[%s4881_s3 + $0x344] ss:$24 sps:$4 sm:$0xff]   ;;  %v3481_v31 = vld [vmem:[%s4881_s3 + $0x330] ss:$24 sps:$4 sm:$0xff]   ;;  %v3482_v35 = vld [vmem:[%s4881_s3 + $0x340] ss:$24 sps:$4 sm:$0xff]  }
  0x30   : > { %791 = vmatprep.subr.bf16.mxu1 %v3453_v13  ;;  %877 = vmatprep.subr.bf16.mxu0 %v3455_v14  ;;  %v309_v32 = vld [vmem:[%s3896_s6 + $0x8] sm:$0xff]  ;;  %v311_v33 = vld [vmem:[%s3896_s6 + $0x18] sm:$0xff]  ;;  %v4021_v38 = vld [vmem:[%s3896_s6] sm:$0xff]  ;;  %vm456_vm1 = vsmask.f32 7424  ;;  %vm1419_vm2 = vcmask 1046528  }
  0x31   : > { %314 = vst.msk [vmem:[#allocation2 + $0x8] sm:$0xff] %vm313_vm0, %v309_v32  ;;  %v318_v34 = vld [vmem:[%s3901_s10 + $0x8] sm:$0xff]  ;;  %v3483_v36 = vld [vmem:[%s4881_s3 + $0x364] ss:$24 sps:$4 sm:$0xff]   ;;  %316 = vst.msk [vmem:[#allocation2 + $0x18] sm:$0xff] %vm313_vm0, %v311_v33 }
  0x32   : > { %320 = vst.msk [vmem:[#allocation2 + $0x28] sm:$0xff] %vm313_vm0, %v318_v34  ;;  %v3485_v37 = vld [vmem:[%s4881_s3 + $0x374] ss:$24 sps:$4 sm:$0xff]   ;;  %312 = vst [vmem:[#allocation2] sm:$0xff] %v4021_v38  ;;  %v317_v40 = vld [vmem:[%s3901_s10] sm:$0xff] }
  0x33   : > { %792 = vmatpush1.bf16.msra.mxu1 %v3457_v15  ;;  %878 = vmatpush1.bf16.msra.mxu0 %v3458_v16  ;;  %v4024_v39 = vld [vmem:[%s3896_s6 + $0x10] sm:$0xff]  ;;  %v3487_v41 = vld [vmem:[%s4881_s3 + $0x360] ss:$24 sps:$4 sm:$0xff]   ;;  %319 = vst [vmem:[#allocation2 + $0x20] sm:$0xff] %v317_v40  ;;  %v3491_v44 = vld [vmem:[%s4881_s3 + $0x3a4] ss:$24 sps:$4 sm:$0xff]  }
  0x34   : > { %793 = vmatprep.subr.bf16.mxu1 %v3459_v17  ;;  %879 = vmatprep.subr.bf16.mxu0 %v3461_v18  ;;  %315 = vst [vmem:[#allocation2 + $0x10] sm:$0xff] %v4024_v39  ;;  %v3488_v42 = vld [vmem:[%s4881_s3 + $0x370] ss:$24 sps:$4 sm:$0xff]   ;;  %v3489_v43 = vld [vmem:[%s4881_s3 + $0x394] ss:$24 sps:$4 sm:$0xff]  }
  0x35   : > { %v3493_v46 = vld [vmem:[%s4881_s3 + $0x390] ss:$24 sps:$4 sm:$0xff]   ;;  %v3494_v49 = vld [vmem:[%s4881_s3 + $0x3a0] ss:$24 sps:$4 sm:$0xff]   ;;  %v3497_v52 = vld [vmem:[%s4881_s3 + $0x1ec] ss:$24 sps:$4 sm:$0xff]  }
  0x36   : > { %v3500_v53 = vld [vmem:[%s4881_s3 + $0x4] ss:$24 sps:$4 sm:$0xff]   ;;  %v3495_v5 = vld [vmem:[%s4881_s3 + $0x1e8] ss:$24 sps:$4 sm:$0xff]   ;;  %v3506_v10 = vld [vmem:[%s4881_s3 + $0x34] ss:$24 sps:$4 sm:$0xff]  }
  0x37   : > { %794 = vmatpush1.bf16.msra.mxu1 %v3463_v19  ;;  %880 = vmatpush1.bf16.msra.mxu0 %v3464_v20  ;;  %v3498_v7 = vld [vmem:[%s4881_s3] ss:$24 sps:$4 sm:$0xff]   ;;  %v3503_v9 = vld [vmem:[%s4881_s3 + $0x21c] ss:$24 sps:$4 sm:$0xff]   ;;  %v3504_v13 = vld [vmem:[%s4881_s3 + $0x30] ss:$24 sps:$4 sm:$0xff]  }
  0x38   : > { %795 = vmatprep.subr.bf16.mxu1 %v3465_v21  ;;  %881 = vmatprep.subr.bf16.mxu0 %v3467_v22  ;;  %v388_v45 = vld [vmem:[#allocation2 + $0x8] sm:$0xfe]  ;;  %v4044_v47 = vld [vmem:[#allocation2 + $0x18] sm:$0xff]  ;;  %vm1940_vm3 = vsmask.f32 6400 }
  0x39   : > { %v390_v48 = vld [vmem:[#allocation2 + $0x28] sm:$0x1]  ;;  %v392_v50 = vpack.c.bf16 %v4044_v47, %v388_v45  ;;  %v387_v57 = vld [vmem:[#allocation2] sm:$0xfe]  ;;  %v3501_v12 = vld [vmem:[%s4881_s3 + $0x218] ss:$24 sps:$4 sm:$0xff]  }
  0x3a   : > { %v394_v51 = vpack.c.bf16 %v390_v48, %v390_v48  ;;  %v389_v58 = vld [vmem:[#allocation2 + $0x20] sm:$0x1]  ;;  %v391_v59 = vpack.c.bf16 %v4024_v39, %v387_v57  ;;  %v3509_v14 = vld [vmem:[%s4881_s3 + $0x24c] ss:$24 sps:$4 sm:$0xff]   ;;  %v3515_v18 = vld [vmem:[%s4881_s3 + $0x27c] ss:$24 sps:$4 sm:$0xff]  }
  0x3b   : > { %796 = vmatpush1.bf16.msra.mxu1 %v3469_v23  ;;  %882 = vmatpush1.bf16.msra.mxu0 %v3470_v24  ;;  %v470_v54 = vshrl.u32 %v392_v50, 16  ;;  %v472_v55 = vshll.u32 %v392_v50, 16  ;;  %v393_v62 = vpack.c.bf16 %v389_v58, %v389_v58  ;;  %v3512_v15 = vld [vmem:[%s4881_s3 + $0x64] ss:$24 sps:$4 sm:$0xff]   ;;  %v3507_v16 = vld [vmem:[%s4881_s3 + $0x248] ss:$24 sps:$4 sm:$0xff]  }
  0x3c   : > { %797 = vmatprep.subr.bf16.mxu1 %v3471_v25  ;;  %883 = vmatprep.subr.bf16.mxu0 %v3473_v26  ;;  %v477_v56 = vshll.u32 %v394_v51, 16  ;;  %v458_v63 = vshrl.u32 %v391_v59, 16  ;;  %v460_v0 = vshll.u32 %v391_v59, 16  ;;  %v3510_v17 = vld [vmem:[%s4881_s3 + $0x60] ss:$24 sps:$4 sm:$0xff]   ;;  %v322_v22 = vld [vmem:[#allocation2 + $0x8] sm:$0xff] }
  0x3d   : > { %v474_v60 = vrot.slane %v472_v55, 1  ;;  %v465_v2 = vshll.u32 %v393_v62, 16  ;;  %v3518_v19 = vld [vmem:[%s4881_s3 + $0x94] ss:$24 sps:$4 sm:$0xff]   ;;  %v3513_v20 = vld [vmem:[%s4881_s3 + $0x278] ss:$24 sps:$4 sm:$0xff]   ;;  %v4115_v25 = vpack.c.bf16 %v4044_v47, %v322_v22 }
  0x3e   : > { %v479_v61 = vrot.slane %v477_v56, 1  ;;  %v462_v3 = vrot.slane %v460_v0, 1  ;;  %v3516_v21 = vld [vmem:[%s4881_s3 + $0x90] ss:$24 sps:$4 sm:$0xff]   ;;  %v3521_v23 = vld [vmem:[%s4881_s3 + $0x2ac] ss:$24 sps:$4 sm:$0xff]  }
  0x3f   : > { %798 = vmatpush1.bf16.msra.mxu1 %v3475_v27  ;;  %884 = vmatpush1.bf16.msra.mxu0 %v3476_v28  ;;  %v475_v1 = vor.u32 %v474_v60, %v470_v54  ;;  %v467_v6 = vrot.slane %v465_v2, 1  ;;  %v3524_v24 = vld [vmem:[%s4881_s3 + $0xc4] ss:$24 sps:$4 sm:$0xff]   ;;  %v3519_v26 = vld [vmem:[%s4881_s3 + $0x2a8] ss:$24 sps:$4 sm:$0xff]  }
  0x40   : > { %799 = vmatprep.subr.bf16.mxu1 %v3477_v29  ;;  %885 = vmatprep.subr.bf16.mxu0 %v3479_v30  ;;  %v463_v8 = vor.u32 %v462_v3, %v458_v63  ;;  %v3522_v27 = vld [vmem:[%s4881_s3 + $0xc0] ss:$24 sps:$4 sm:$0xff]   ;;  %v3527_v28 = vld [vmem:[%s4881_s3 + $0x2dc] ss:$24 sps:$4 sm:$0xff]   ;;  %v3533_v32 = vld [vmem:[%s4881_s3 + $0x30c] ss:$24 sps:$4 sm:$0xff]  }
  0x41   : > { %v480_v4 = vsel %vm456_vm1, %v475_v1, %v479_v61  ;;  %v3530_v29 = vld [vmem:[%s4881_s3 + $0xf4] ss:$24 sps:$4 sm:$0xff]   ;;  %v3525_v30 = vld [vmem:[%s4881_s3 + $0x2d8] ss:$24 sps:$4 sm:$0xff]   ;;  %v3536_v33 = vld [vmem:[%s4881_s3 + $0x124] ss:$24 sps:$4 sm:$0xff]  }
  0x42   : > { %2899 = vmatprep.mubr.msk.bf16.mxu1 %vm313_vm0, %v480_v4  ;;  %2901 = vmatprep.mubr.msk.bf16.mxu0 %vm313_vm0, %v480_v4  ;;  %v4073_v11 = vsel %vm456_vm1, %v463_v8, %v467_v6  ;;  %v3531_v34 = vld [vmem:[%s4881_s3 + $0x308] ss:$24 sps:$4 sm:$0xff]   ;;  %v3537_v40 = vld [vmem:[%s4881_s3 + $0x338] ss:$24 sps:$4 sm:$0xff]   ;;  %v3554_v48 = vld [vmem:[%s4881_s3 + $0x1b4] ss:$24 sps:$4 sm:$0xff]  }
  0x43   : > { %800 = vmatpush1.bf16.msra.mxu1 %v3481_v31  ;;  %886 = vmatpush1.bf16.msra.mxu0 %v3482_v35  ;;  %v3528_v31 = vld [vmem:[%s4881_s3 + $0xf0] ss:$24 sps:$4 sm:$0xff]   ;;  %v3534_v35 = vld [vmem:[%s4881_s3 + $0x120] ss:$24 sps:$4 sm:$0xff]   ;;  %v3557_v51 = vld [vmem:[%s4881_s3 + $0xc] ss:$24 sps:$4 sm:$0xff]  }
  0x44   : > { %801 = vmatprep.subr.bf16.mxu1 %v3483_v36  ;;  %887 = vmatprep.subr.bf16.mxu0 %v3485_v37  ;;  %v3539_v36 = vld [vmem:[%s4881_s3 + $0x33c] ss:$24 sps:$4 sm:$0xff]   ;;  %v3546_v45 = vld [vmem:[%s4881_s3 + $0x180] ss:$24 sps:$4 sm:$0xff]   ;;  %v3552_v50 = vld [vmem:[%s4881_s3 + $0x1b0] ss:$24 sps:$4 sm:$0xff]  }
  0x45   : > { %v3542_v37 = vld [vmem:[%s4881_s3 + $0x154] ss:$24 sps:$4 sm:$0xff]   ;;  %v3555_v54 = vld [vmem:[%s4881_s3 + $0x8] ss:$24 sps:$4 sm:$0xff]   ;;  %v3561_v57 = vld [vmem:[%s4881_s3 + $0x38] ss:$24 sps:$4 sm:$0xff]  }
  0x46   : > { %v3558_v55 = vld [vmem:[%s4881_s3 + $0x10] ss:$24 sps:$4 sm:$0xff]   ;;  %v3563_v56 = vld [vmem:[%s4881_s3 + $0x3c] ss:$24 sps:$4 sm:$0xff]   ;;  %v3564_v58 = vld [vmem:[%s4881_s3 + $0x40] ss:$24 sps:$4 sm:$0xff]  }
  0x47   : > { %802 = vmatpush1.bf16.msra.mxu1 %v3487_v41  ;;  %888 = vmatpush1.bf16.msra.mxu0 %v3488_v42  ;;  %v3540_v41 = vld [vmem:[%s4881_s3 + $0x150] ss:$24 sps:$4 sm:$0xff]   ;;  %v3545_v42 = vld [vmem:[%s4881_s3 + $0x36c] ss:$24 sps:$4 sm:$0xff]   ;;  %v3575_v63 = vld [vmem:[%s4881_s3 + $0x9c] ss:$24 sps:$4 sm:$0xff]  }
  0x48   : > { %803 = vmatprep.subr.bf16.mxu1 %v3489_v43  ;;  %889 = vmatprep.subr.bf16.mxu0 %v3491_v44  ;;  %v3548_v43 = vld [vmem:[%s4881_s3 + $0x184] ss:$24 sps:$4 sm:$0xff]   ;;  %v3543_v44 = vld [vmem:[%s4881_s3 + $0x368] ss:$24 sps:$4 sm:$0xff]   ;;  %v3572_v60 = vld [vmem:[%s4881_s3 + $0x74] ss:$24 sps:$4 sm:$0xff]  }
  0x49   : > { %v3569_v59 = vld [vmem:[%s4881_s3 + $0x6c] ss:$24 sps:$4 sm:$0xff]   ;;  %v3567_v61 = vld [vmem:[%s4881_s3 + $0x68] ss:$24 sps:$4 sm:$0xff]   ;;  %v3573_v1 = vld [vmem:[%s4881_s3 + $0x98] ss:$24 sps:$4 sm:$0xff]  }
  0x4a   : > { %v3570_v62 = vld [vmem:[%s4881_s3 + $0x70] ss:$24 sps:$4 sm:$0xff]   ;;  %v3578_v0 = vld [vmem:[%s4881_s3 + $0xa4] ss:$24 sps:$4 sm:$0xff]   ;;  %v3576_v2 = vld [vmem:[%s4881_s3 + $0xa0] ss:$24 sps:$4 sm:$0xff]  }
  0x4b   : > { %804 = vmatpush1.bf16.msra.mxu1 %v3493_v46  ;;  %890 = vmatpush1.bf16.msra.mxu0 %v3494_v49  ;;  %v3551_v46 = vld [vmem:[%s4881_s3 + $0x39c] ss:$24 sps:$4 sm:$0xff]   ;;  %v3549_v49 = vld [vmem:[%s4881_s3 + $0x398] ss:$24 sps:$4 sm:$0xff]   ;;  %v3581_v3 = vld [vmem:[%s4881_s3 + $0xcc] ss:$24 sps:$4 sm:$0xff]  }
  0x4c   : > { %828 = vmatprep.subr.bf16.mxu1 %v3497_v52  ;;  %1217 = vmatprep.subr.bf16.mxu0 %v3500_v53  ;;  %v3560_v52 = vld [vmem:[%s4881_s3 + $0x14] ss:$24 sps:$4 sm:$0xff]   ;;  %v4193_v53 = vpack.c.bf16 %v4024_v39, %v4021_v38  ;;  %v3566_v38 = vld [vmem:[%s4881_s3 + $0x44] ss:$24 sps:$4 sm:$0xff]   ;;  %v3582_v6 = vld [vmem:[%s4881_s3 + $0xd0] ss:$24 sps:$4 sm:$0xff]  }
  0x4d   : > { %v3590_v8 = vld [vmem:[%s4881_s3 + $0x104] ss:$24 sps:$4 sm:$0xff]   ;;  %v3606_v22 = vld [vmem:[%s4881_s3 + $0x190] ss:$24 sps:$4 sm:$0xff]  }
  0x4e   : > { %818 = vmatmul.mubr.bf16.vlgmr.msra.gmra.mrb[0].mxu1 %v4073_v11  ;;  %904 = vmatmul.mubr.bf16.vlgmr.msra.gmra.mrb[0].mxu0 %v4073_v11 }
  0x4f   : > { %829 = vmatpush1.bf16.msra.mxu1 %v3495_v5  ;;  %1218 = vmatpush1.bf16.msra.mxu0 %v3498_v7  ;;  %v3579_v5 = vld [vmem:[%s4881_s3 + $0xc8] ss:$24 sps:$4 sm:$0xff]   ;;  %v3587_v7 = vld [vmem:[%s4881_s3 + $0xfc] ss:$24 sps:$4 sm:$0xff]  }
  0x50   : > { %830 = vmatprep.subr.bf16.mxu1 %v3503_v9  ;;  %1219 = vmatprep.subr.bf16.mxu0 %v3506_v10  ;;  %v3585_v9 = vld [vmem:[%s4881_s3 + $0xf8] ss:$24 sps:$4 sm:$0xff]  }
  0x51   : > { %2900 = vmatprep.mubr.msk.bf16.mxu1 %vm313_vm0, %v480_v4  ;;  %2962 = vmatprep.mubr.msk.bf16.mxu0 %vm313_vm0, %v4115_v25  ;;  %v3584_v4 = vld [vmem:[%s4881_s3 + $0xd4] ss:$24 sps:$4 sm:$0xff]   ;;  %v3588_v10 = vld [vmem:[%s4881_s3 + $0x100] ss:$24 sps:$4 sm:$0xff]  }
  0x53   : > { %831 = vmatpush1.bf16.msra.mxu1 %v3501_v12  ;;  %1220 = vmatpush1.bf16.msra.mxu0 %v3504_v13  ;;  %v3596_v12 = vld [vmem:[%s4881_s3 + $0x134] ss:$24 sps:$4 sm:$0xff]   ;;  %v3591_v13 = vld [vmem:[%s4881_s3 + $0x128] ss:$24 sps:$4 sm:$0xff]  }
  0x54   : > { %832 = vmatprep.subr.bf16.mxu1 %v3509_v14  ;;  %1221 = vmatprep.subr.bf16.mxu0 %v3512_v15  ;;  %v3594_v14 = vld [vmem:[%s4881_s3 + $0x130] ss:$24 sps:$4 sm:$0xff]   ;;  %v3599_v15 = vld [vmem:[%s4881_s3 + $0x15c] ss:$24 sps:$4 sm:$0xff]  }
  0x57   : > { %833 = vmatpush1.bf16.msra.mxu1 %v3507_v16  ;;  %1222 = vmatpush1.bf16.msra.mxu0 %v3510_v17  ;;  %v3602_v16 = vld [vmem:[%s4881_s3 + $0x164] ss:$24 sps:$4 sm:$0xff]   ;;  %v3597_v17 = vld [vmem:[%s4881_s3 + $0x158] ss:$24 sps:$4 sm:$0xff]  }
  0x58   : > { %834 = vmatprep.subr.bf16.mxu1 %v3515_v18  ;;  %1223 = vmatprep.subr.bf16.mxu0 %v3518_v19  ;;  %v3600_v18 = vld [vmem:[%s4881_s3 + $0x160] ss:$24 sps:$4 sm:$0xff]   ;;  %v3605_v19 = vld [vmem:[%s4881_s3 + $0x18c] ss:$24 sps:$4 sm:$0xff]  }
  0x5b   : > { %835 = vmatpush1.bf16.msra.mxu1 %v3513_v20  ;;  %1224 = vmatpush1.bf16.msra.mxu0 %v3516_v21  ;;  %v3608_v20 = vld [vmem:[%s4881_s3 + $0x194] ss:$24 sps:$4 sm:$0xff]   ;;  %v3603_v21 = vld [vmem:[%s4881_s3 + $0x188] ss:$24 sps:$4 sm:$0xff]  }
  0x5c   : > { %836 = vmatprep.subr.bf16.mxu1 %v3521_v23  ;;  %1225 = vmatprep.subr.bf16.mxu0 %v3524_v24  ;;  %v3611_v23 = vld [vmem:[%s4881_s3 + $0x1bc] ss:$24 sps:$4 sm:$0xff]   ;;  %v1347_v24 = vld [vmem:[#allocation2 + $0x8] sm:$0xfc] }
  0x5f   : > { %837 = vmatpush1.bf16.msra.mxu1 %v3519_v26  ;;  %1226 = vmatpush1.bf16.msra.mxu0 %v3522_v27  ;;  %v3614_v26 = vld [vmem:[%s4881_s3 + $0x1c4] ss:$24 sps:$4 sm:$0xff]   ;;  %v3609_v27 = vld [vmem:[%s4881_s3 + $0x1b8] ss:$24 sps:$4 sm:$0xff]  }
  0x60   : > { %838 = vmatprep.subr.bf16.mxu1 %v3527_v28  ;;  %1227 = vmatprep.subr.bf16.mxu0 %v3530_v29  ;;  %v1351_v28 = vpack.c.bf16 %v4044_v47, %v1347_v24 }
  0x63   : > { %839 = vmatpush1.bf16.msra.mxu1 %v3525_v30  ;;  %1228 = vmatpush1.bf16.msra.mxu0 %v3528_v31  ;;  %v3612_v30 = vld [vmem:[%s4881_s3 + $0x1c0] ss:$24 sps:$4 sm:$0xff]   ;;  %v3617_v31 = vld [vmem:[%s4881_s3 + $0x3c4] ss:$24 sps:$4 sm:$0xff]  }
  0x64   : > { %840 = vmatprep.subr.bf16.mxu1 %v3533_v32  ;;  %1229 = vmatprep.subr.bf16.mxu0 %v3536_v33  ;;  %v3620_v32 = vld [vmem:[%s4881_s3 + $0x3cc] ss:$24 sps:$4 sm:$0xff]   ;;  %v3615_v33 = vld [vmem:[%s4881_s3 + $0x3c0] ss:$24 sps:$4 sm:$0xff]  }
  0x67   : > { %841 = vmatpush1.bf16.msra.mxu1 %v3531_v34  ;;  %1230 = vmatpush1.bf16.msra.mxu0 %v3534_v35  ;;  %v1423_v34 = vrot.slane %v1351_v28, 1  ;;  %v3677_v28 = vld [vmem:[%s4881_s3 + $0x3d4] ss:$24 sps:$4 sm:$0xff]  }
  0x68   : > { %842 = vmatprep.subr.bf16.mxu1 %v3539_v36  ;;  %1231 = vmatprep.subr.bf16.mxu0 %v3542_v37  ;;  %v3618_v36 = vld [vmem:[%s4881_s3 + $0x3c8] ss:$24 sps:$4 sm:$0xff]   ;;  %v3623_v37 = vld [vmem:[%s4881_s3 + $0x3f4] ss:$24 sps:$4 sm:$0xff]  }
  0x6b   : > { %843 = vmatpush1.bf16.msra.mxu1 %v3537_v40  ;;  %1232 = vmatpush1.bf16.msra.mxu0 %v3540_v41  ;;  %v3626_v40 = vld [vmem:[%s4881_s3 + $0x3fc] ss:$24 sps:$4 sm:$0xff]   ;;  %v3621_v41 = vld [vmem:[%s4881_s3 + $0x3f0] ss:$24 sps:$4 sm:$0xff]  }
  0x6c   : > { %844 = vmatprep.subr.bf16.mxu1 %v3545_v42  ;;  %1233 = vmatprep.subr.bf16.mxu0 %v3548_v43  ;;  %v3624_v43 = vld [vmem:[%s4881_s3 + $0x3f8] ss:$24 sps:$4 sm:$0xff]  }
  0x6f   : > { %845 = vmatpush1.bf16.msra.mxu1 %v3543_v44  ;;  %1234 = vmatpush1.bf16.msra.mxu0 %v3546_v45  ;;  %v3629_v44 = vld [vmem:[%s4881_s3 + $0x424] ss:$24 sps:$4 sm:$0xff]  }
  0x70   : > { %846 = vmatprep.subr.bf16.mxu1 %v3551_v46  ;;  %1235 = vmatprep.subr.bf16.mxu0 %v3554_v48  ;;  %v3632_v45 = vld [vmem:[%s4881_s3 + $0x42c] ss:$24 sps:$4 sm:$0xff]   ;;  %v3627_v46 = vld [vmem:[%s4881_s3 + $0x420] ss:$24 sps:$4 sm:$0xff]  }
  0x71   : > { %v3630_v48 = vld [vmem:[%s4881_s3 + $0x428] ss:$24 sps:$4 sm:$0xff]  }
  0x73   : > { %847 = vmatpush1.bf16.msra.mxu1 %v3549_v49  ;;  %1236 = vmatpush1.bf16.msra.mxu0 %v3552_v50  ;;  %v3635_v49 = vld [vmem:[%s4881_s3 + $0x454] ss:$24 sps:$4 sm:$0xff]  }
  0x74   : > { %1260 = vmatprep.subr.bf16.mxu1 %v3557_v51  ;;  %1303 = vmatprep.subr.bf16.mxu0 %v3560_v52  ;;  %v3638_v50 = vld [vmem:[%s4881_s3 + $0x45c] ss:$24 sps:$4 sm:$0xff]   ;;  %v3633_v51 = vld [vmem:[%s4881_s3 + $0x450] ss:$24 sps:$4 sm:$0xff]  }
  0x75   : > { %v3636_v52 = vld [vmem:[%s4881_s3 + $0x458] ss:$24 sps:$4 sm:$0xff]  }
  0x76   : > { %861 = vmatmul.mubr.bf16.vlgmr.msra.gmra.mrb[4].mxu1 %v4073_v11  ;;  %1250 = vmatmul.mubr.bf16.vlgmr.msra.gmra.mrb[4].mxu0 %v4193_v53  ;;  %v3593_v11 = vld [vmem:[%s4881_s3 + $0x12c] ss:$24 sps:$4 sm:$0xff]  }
  0x77   : > { %1261 = vmatpush1.bf16.msra.mxu1 %v3555_v54  ;;  %1304 = vmatpush1.bf16.msra.mxu0 %v3558_v55  ;;  %v3644_v54 = vld [vmem:[%s4881_s3 + $0x48c] ss:$24 sps:$4 sm:$0xff]   ;;  %v3639_v55 = vld [vmem:[%s4881_s3 + $0x480] ss:$24 sps:$4 sm:$0xff]  }
  0x78   : > { %1262 = vmatprep.subr.bf16.mxu1 %v3563_v56  ;;  %1305 = vmatprep.subr.bf16.mxu0 %v3566_v38  ;;  %v3642_v56 = vld [vmem:[%s4881_s3 + $0x488] ss:$24 sps:$4 sm:$0xff]   ;;  %v3647_v38 = vld [vmem:[%s4881_s3 + $0x4b4] ss:$24 sps:$4 sm:$0xff]  }
  0x79   : > { %2963 = vmatprep.mubr.msk.bf16.mxu1 %vm313_vm0, %v4115_v25  ;;  %2964 = vmatprep.mubr.msk.bf16.mxu0 %vm313_vm0, %v4115_v25  ;;  %v1349_v25 = vld [vmem:[#allocation2 + $0x28] sm:$0x3] }
  0x7a   : > { %v1353_v29 = vpack.c.bf16 %v1349_v25, %v1349_v25 }
  0x7b   : > { %1263 = vmatpush1.bf16.msra.mxu1 %v3561_v57  ;;  %1306 = vmatpush1.bf16.msra.mxu0 %v3564_v58  ;;  %v3650_v57 = vld [vmem:[%s4881_s3 + $0x4bc] ss:$24 sps:$4 sm:$0xff]   ;;  %v3645_v58 = vld [vmem:[%s4881_s3 + $0x4b0] ss:$24 sps:$4 sm:$0xff]  }
  0x7c   : > { %1264 = vmatprep.subr.bf16.mxu1 %v3569_v59  ;;  %1307 = vmatprep.subr.bf16.mxu0 %v3572_v60  ;;  %v1424_v35 = vrot.slane %v1353_v29, 1  ;;  %v3648_v59 = vld [vmem:[%s4881_s3 + $0x4b8] ss:$24 sps:$4 sm:$0xff]   ;;  %v3653_v60 = vld [vmem:[%s4881_s3 + $0x4e4] ss:$24 sps:$4 sm:$0xff]  }
  0x7d   : > { %v3680_v29 = vld [vmem:[%s4881_s3 + $0x5ac] ss:$24 sps:$4 sm:$0xff]  }
  0x7e   : > { %v4340_v42 = vsel %vm1419_vm2, %v1423_v34, %v1424_v35  ;;  %v3683_v35 = vld [vmem:[%s4881_s3 + $0x404] ss:$24 sps:$4 sm:$0xff]  }
  0x7f   : > { %1265 = vmatpush1.bf16.msra.mxu1 %v3567_v61  ;;  %1308 = vmatpush1.bf16.msra.mxu0 %v3570_v62  ;;  %v3656_v61 = vld [vmem:[%s4881_s3 + $0x4ec] ss:$24 sps:$4 sm:$0xff]   ;;  %v3651_v62 = vld [vmem:[%s4881_s3 + $0x4e0] ss:$24 sps:$4 sm:$0xff]  }
  0x80   : > { %1266 = vmatprep.subr.bf16.mxu1 %v3575_v63  ;;  %1309 = vmatprep.subr.bf16.mxu0 %v3578_v0  ;;  %v3654_v63 = vld [vmem:[%s4881_s3 + $0x4e8] ss:$24 sps:$4 sm:$0xff]  }
  0x81   : > { %v1872_v0 = vld [vmem:[#allocation2 + $0x8] sm:$0xf8] }
  0x83   : > { %1267 = vmatpush1.bf16.msra.mxu1 %v3573_v1  ;;  %1310 = vmatpush1.bf16.msra.mxu0 %v3576_v2  ;;  %v1874_v1 = vld [vmem:[#allocation2 + $0x28] sm:$0x7]  ;;  %v3659_v2 = vld [vmem:[%s4881_s3 + $0x514] ss:$24 sps:$4 sm:$0xff]  }
  0x84   : > { %1268 = vmatprep.subr.bf16.mxu1 %v3581_v3  ;;  %1311 = vmatprep.subr.bf16.mxu0 %v3584_v4  ;;  %v3662_v3 = vld [vmem:[%s4881_s3 + $0x51c] ss:$24 sps:$4 sm:$0xff]   ;;  %v3657_v4 = vld [vmem:[%s4881_s3 + $0x510] ss:$24 sps:$4 sm:$0xff]  }
  0x87   : > { %1269 = vmatpush1.bf16.msra.mxu1 %v3579_v5  ;;  %1312 = vmatpush1.bf16.msra.mxu0 %v3582_v6  ;;  %v3660_v5 = vld [vmem:[%s4881_s3 + $0x518] ss:$24 sps:$4 sm:$0xff]   ;;  %v3665_v6 = vld [vmem:[%s4881_s3 + $0x544] ss:$24 sps:$4 sm:$0xff]  }
  0x88   : > { %1270 = vmatprep.subr.bf16.mxu1 %v3587_v7  ;;  %1313 = vmatprep.subr.bf16.mxu0 %v3590_v8  ;;  %v1876_v7 = vpack.c.bf16 %v4044_v47, %v1872_v0  ;;  %v1878_v8 = vpack.c.bf16 %v1874_v1, %v1874_v1  ;;  %v3666_v47 = vld [vmem:[%s4881_s3 + $0x548] ss:$24 sps:$4 sm:$0xff]   ;;  %v3799_v0 = vld [vmem:[#allocation2 + $0x10] sm:$0xff] }
  0x8b   : > { %1271 = vmatpush1.bf16.msra.mxu1 %v3585_v9  ;;  %1314 = vmatpush1.bf16.msra.mxu0 %v3588_v10  ;;  %v3668_v9 = vld [vmem:[%s4881_s3 + $0x54c] ss:$24 sps:$4 sm:$0xff]  }
  0x8c   : > { %1272 = vmatprep.subr.bf16.mxu1 %v3593_v11  ;;  %1315 = vmatprep.subr.bf16.mxu0 %v3596_v12  ;;  %v1346_v10 = vld [vmem:[#allocation2] sm:$0xfc]  ;;  %v1348_v11 = vld [vmem:[#allocation2 + $0x20] sm:$0x3] }
  0x8d   : > { %v3663_v12 = vld [vmem:[%s4881_s3 + $0x540] ss:$24 sps:$4 sm:$0xff]  }
  0x8f   : > { %1273 = vmatpush1.bf16.msra.mxu1 %v3591_v13  ;;  %1316 = vmatpush1.bf16.msra.mxu0 %v3594_v14  ;;  %v1959_v13 = vshrl.u32 %v1876_v7, 16  ;;  %v1962_v14 = vshll.u32 %v1876_v7, 16 }
  0x90   : > { %1274 = vmatprep.subr.bf16.mxu1 %v3599_v15  ;;  %1317 = vmatprep.subr.bf16.mxu0 %v3602_v16  ;;  %v1967_v15 = vshrl.u32 %v1878_v8, 16  ;;  %v1970_v16 = vshll.u32 %v1878_v8, 16 }
  0x92   : > { %v1969_v24 = vrot.slane %v1967_v15, 1  ;;  %v1972_v25 = vrot.slane %v1970_v16, 2 }
  0x93   : > { %1275 = vmatpush1.bf16.msra.mxu1 %v3597_v17  ;;  %1318 = vmatpush1.bf16.msra.mxu0 %v3600_v18  ;;  %v1350_v17 = vpack.c.bf16 %v4024_v39, %v1346_v10  ;;  %v1352_v18 = vpack.c.bf16 %v1348_v11, %v1348_v11  ;;  %v3672_v39 = vld [vmem:[%s4881_s3 + $0x578] ss:$24 sps:$4 sm:$0xff]   ;;  %v3725_v11 = vld [vmem:[%s4881_s3 + $0x554] ss:$24 sps:$4 sm:$0xff]  }
  0x94   : > { %1276 = vmatprep.subr.bf16.mxu1 %v3605_v19  ;;  %1319 = vmatprep.subr.bf16.mxu0 %v3608_v20  ;;  %v3671_v19 = vld [vmem:[%s4881_s3 + $0x574] ss:$24 sps:$4 sm:$0xff]  }
  0x95   : > { %v3674_v20 = vld [vmem:[%s4881_s3 + $0x57c] ss:$24 sps:$4 sm:$0xff]  }
  0x97   : > { %1277 = vmatpush1.bf16.msra.mxu1 %v3603_v21  ;;  %1320 = vmatpush1.bf16.msra.mxu0 %v3606_v22  ;;  %v3669_v21 = vld [vmem:[%s4881_s3 + $0x570] ss:$24 sps:$4 sm:$0xff]   ;;  %v1961_v22 = vrot.slane %v1959_v13, 1 }
  0x98   : > { %1278 = vmatprep.subr.bf16.mxu1 %v3611_v23  ;;  %1321 = vmatprep.subr.bf16.mxu0 %v3614_v26  ;;  %v1964_v23 = vrot.slane %v1962_v14, 2  ;;  %v1420_v26 = vrot.slane %v1350_v17, 1  ;;  %v3723_v13 = vld [vmem:[%s4881_s3 + $0x550] ss:$24 sps:$4 sm:$0xff]  }
  0x99   : > { %v3726_v14 = vld [vmem:[%s4881_s3 + $0x728] ss:$24 sps:$4 sm:$0xff]  }
  0x9b   : > { %1279 = vmatpush1.bf16.msra.mxu1 %v3609_v27  ;;  %1322 = vmatpush1.bf16.msra.mxu0 %v3612_v30  ;;  %v1421_v27 = vrot.slane %v1352_v18, 1  ;;  %v3675_v30 = vld [vmem:[%s4881_s3 + $0x3d0] ss:$24 sps:$4 sm:$0xff]   ;;  %v3731_v18 = vld [vmem:[%s4881_s3 + $0x584] ss:$24 sps:$4 sm:$0xff]  }
  0x9c   : > { %1730 = vmatprep.subr.bf16.mxu0 %v3617_v31  ;;  %1773 = vmatprep.subr.bf16.mxu1 %v3620_v32  ;;  %v1965_v31 = vor.u32 %v1964_v23, %v1961_v22  ;;  %v1973_v32 = vor.u32 %v1972_v25, %v1969_v24  ;;  %v3737_v24 = vld [vmem:[%s4881_s3 + $0x5a4] ss:$24 sps:$4 sm:$0xff]   ;;  %v3735_v25 = vld [vmem:[%s4881_s3 + $0x5a0] ss:$24 sps:$4 sm:$0xff]  }
  0x9d   : > { %v4460_v34 = vsel %vm1419_vm2, %v1420_v26, %v1421_v27  ;;  %v3740_v26 = vld [vmem:[%s4881_s3 + $0x5d4] ss:$24 sps:$4 sm:$0xff]   ;;  %v3738_v27 = vld [vmem:[%s4881_s3 + $0x5d0] ss:$24 sps:$4 sm:$0xff]  }
  0x9e   : > { %1293 = vmatmul.mubr.bf16.vlgmr.msra.gmra.mrb[4].mxu1 %v4193_v53  ;;  %1336 = vmatmul.mubr.bf16.vlgmr.msra.gmra.mrb[0].mxu0 %v4193_v53  ;;  %v3641_v53 = vld [vmem:[%s4881_s3 + $0x484] ss:$24 sps:$4 sm:$0xff]  }
  0x9f   : > { %1731 = vmatpush1.bf16.msra.mxu0 %v3615_v33  ;;  %1774 = vmatpush1.bf16.msra.mxu1 %v3618_v36  ;;  %v3678_v33 = vld [vmem:[%s4881_s3 + $0x5a8] ss:$24 sps:$4 sm:$0xff]   ;;  %v3686_v36 = vld [vmem:[%s4881_s3 + $0x5dc] ss:$24 sps:$4 sm:$0xff]  }
  0xa0   : > { %1732 = vmatprep.subr.bf16.mxu0 %v3623_v37  ;;  %1775 = vmatprep.subr.bf16.mxu1 %v3626_v40  ;;  %v4471_v37 = vsel %vm1940_vm3, %v1965_v31, %v1973_v32  ;;  %v3681_v40 = vld [vmem:[%s4881_s3 + $0x400] ss:$24 sps:$4 sm:$0xff]   ;;  %v3744_v31 = vld [vmem:[%s4881_s3 + $0x630] ss:$24 sps:$4 sm:$0xff]   ;;  %v3749_v32 = vld [vmem:[%s4881_s3 + $0x664] ss:$24 sps:$4 sm:$0xff]  }
  0xa1   : > { %3085 = vmatprep.mubr.msk.bf16.mxu0 %vm313_vm0, %v4340_v42  ;;  %3086 = vmatprep.mubr.msk.bf16.mxu1 %vm313_vm0, %v4340_v42 }
  0xa3   : > { %1733 = vmatpush1.bf16.msra.mxu0 %v3621_v41  ;;  %1776 = vmatpush1.bf16.msra.mxu1 %v3624_v43  ;;  %v3684_v41 = vld [vmem:[%s4881_s3 + $0x5d8] ss:$24 sps:$4 sm:$0xff]   ;;  %v3689_v43 = vld [vmem:[%s4881_s3 + $0x434] ss:$24 sps:$4 sm:$0xff]  }
  0xa4   : > { %1734 = vmatprep.subr.bf16.mxu0 %v3629_v44  ;;  %1777 = vmatprep.subr.bf16.mxu1 %v3632_v45  ;;  %v3692_v44 = vld [vmem:[%s4881_s3 + $0x60c] ss:$24 sps:$4 sm:$0xff]   ;;  %v3687_v45 = vld [vmem:[%s4881_s3 + $0x430] ss:$24 sps:$4 sm:$0xff]  }
  0xa7   : > { %1735 = vmatpush1.bf16.msra.mxu0 %v3627_v46  ;;  %1778 = vmatpush1.bf16.msra.mxu1 %v3630_v48  ;;  %v3690_v46 = vld [vmem:[%s4881_s3 + $0x608] ss:$24 sps:$4 sm:$0xff]   ;;  %v3695_v48 = vld [vmem:[%s4881_s3 + $0x464] ss:$24 sps:$4 sm:$0xff]  }
  0xa8   : > { %1736 = vmatprep.subr.bf16.mxu0 %v3635_v49  ;;  %1779 = vmatprep.subr.bf16.mxu1 %v3638_v50  ;;  %v3693_v49 = vld [vmem:[%s4881_s3 + $0x460] ss:$24 sps:$4 sm:$0xff]  }
  0xa9   : > { %v3696_v50 = vld [vmem:[%s4881_s3 + $0x638] ss:$24 sps:$4 sm:$0xff]  }
  0xab   : > { %1737 = vmatpush1.bf16.msra.mxu0 %v3633_v51  ;;  %1780 = vmatpush1.bf16.msra.mxu1 %v3636_v52  ;;  %v3701_v51 = vld [vmem:[%s4881_s3 + $0x494] ss:$24 sps:$4 sm:$0xff]  }
  0xac   : > { %1738 = vmatprep.subr.bf16.mxu0 %v3641_v53  ;;  %1781 = vmatprep.subr.bf16.mxu1 %v3644_v54  ;;  %v3704_v52 = vld [vmem:[%s4881_s3 + $0x66c] ss:$24 sps:$4 sm:$0xff]   ;;  %v3699_v53 = vld [vmem:[%s4881_s3 + $0x490] ss:$24 sps:$4 sm:$0xff]  }
  0xad   : > { %v3702_v54 = vld [vmem:[%s4881_s3 + $0x668] ss:$24 sps:$4 sm:$0xff]  }
  0xaf   : > { %1739 = vmatpush1.bf16.msra.mxu0 %v3639_v55  ;;  %1782 = vmatpush1.bf16.msra.mxu1 %v3642_v56  ;;  %v3707_v55 = vld [vmem:[%s4881_s3 + $0x4c4] ss:$24 sps:$4 sm:$0xff]  }
  0xb0   : > { %1740 = vmatprep.subr.bf16.mxu0 %v3647_v38  ;;  %1783 = vmatprep.subr.bf16.mxu1 %v3650_v57  ;;  %v3710_v56 = vld [vmem:[%s4881_s3 + $0x69c] ss:$24 sps:$4 sm:$0xff]   ;;  %v3705_v38 = vld [vmem:[%s4881_s3 + $0x4c0] ss:$24 sps:$4 sm:$0xff]  }
  0xb1   : > { %v3708_v57 = vld [vmem:[%s4881_s3 + $0x698] ss:$24 sps:$4 sm:$0xff]  }
  0xb3   : > { %1741 = vmatpush1.bf16.msra.mxu0 %v3645_v58  ;;  %1784 = vmatpush1.bf16.msra.mxu1 %v3648_v59  ;;  %v3713_v58 = vld [vmem:[%s4881_s3 + $0x4f4] ss:$24 sps:$4 sm:$0xff]  }
  0xb4   : > { %1742 = vmatprep.subr.bf16.mxu0 %v3653_v60  ;;  %1785 = vmatprep.subr.bf16.mxu1 %v3656_v61  ;;  %v3716_v59 = vld [vmem:[%s4881_s3 + $0x6cc] ss:$24 sps:$4 sm:$0xff]   ;;  %v1873_v61 = vld [vmem:[#allocation2 + $0x20] sm:$0x7] }
  0xb5   : > { %v1871_v60 = vld [vmem:[#allocation2] sm:$0xf8] }
  0xb6   : > { %v1875_v1 = vpack.c.bf16 %v3799_v0, %v1871_v60  ;;  %v3788_v0 = vld [vmem:[%s4881_s3 + $0x704] ss:$24 sps:$4 sm:$0xff]  }
  0xb7   : > { %1743 = vmatpush1.bf16.msra.mxu0 %v3651_v62  ;;  %1786 = vmatpush1.bf16.msra.mxu1 %v3654_v63  ;;  %v3711_v62 = vld [vmem:[%s4881_s3 + $0x4f0] ss:$24 sps:$4 sm:$0xff]  }
  0xb8   : > { %1744 = vmatprep.subr.bf16.mxu0 %v3659_v2  ;;  %1787 = vmatprep.subr.bf16.mxu1 %v3662_v3  ;;  %v3714_v63 = vld [vmem:[%s4881_s3 + $0x6c8] ss:$24 sps:$4 sm:$0xff]   ;;  %v1877_v2 = vpack.c.bf16 %v1873_v61, %v1873_v61  ;;  %v3719_v3 = vld [vmem:[%s4881_s3 + $0x524] ss:$24 sps:$4 sm:$0xff]   ;;  %v1942_v7 = vshrl.u32 %v1875_v1, 16  ;;  %v1945_v8 = vshll.u32 %v1875_v1, 16 }
  0xb9   : > { %v3780_v61 = vld [vmem:[%s4881_s3 + $0x6a0] ss:$24 sps:$4 sm:$0xff]  }
  0xba   : > { %v1953_v10 = vshll.u32 %v1877_v2, 16  ;;  %v1944_v15 = vrot.slane %v1942_v7, 1  ;;  %v1947_v16 = vrot.slane %v1945_v8, 2  ;;  %v3786_v1 = vld [vmem:[%s4881_s3 + $0x700] ss:$24 sps:$4 sm:$0xff]   ;;  %v2455_v7 = vld [vmem:[%s4882_s4 + $0x88] sm:$0xff] }
  0xbb   : > { %1745 = vmatpush1.bf16.msra.mxu0 %v3657_v4  ;;  %1788 = vmatpush1.bf16.msra.mxu1 %v3660_v5  ;;  %v3722_v4 = vld [vmem:[%s4881_s3 + $0x6fc] ss:$24 sps:$4 sm:$0xff]   ;;  %v3717_v5 = vld [vmem:[%s4881_s3 + $0x520] ss:$24 sps:$4 sm:$0xff]  }
  0xbc   : > { %1746 = vmatprep.subr.bf16.mxu0 %v3665_v6  ;;  %1789 = vmatprep.subr.bf16.mxu1 %v3668_v9  ;;  %v3720_v6 = vld [vmem:[%s4881_s3 + $0x6f8] ss:$24 sps:$4 sm:$0xff]   ;;  %v1950_v9 = vshrl.u32 %v1877_v2, 16  ;;  %v1955_v17 = vrot.slane %v1953_v10, 2  ;;  %v1948_v22 = vor.u32 %v1947_v16, %v1944_v15  ;;  %v3791_v2 = vld [vmem:[%s4881_s3 + $0x734] ss:$24 sps:$4 sm:$0xff]  }
  0xbd   : > { %v2438_v8 = vld [vmem:[%s4882_s4] sm:$0xff]  ;;  %v2439_v10 = vld [vmem:[%s4882_s4 + $0x8] sm:$0xff]  ;;  %v2440_v15 = vld [vmem:[%s4882_s4 + $0x10] sm:$0xff] }
  0xbe   : > { %v2441_v16 = vld [vmem:[%s4882_s4 + $0x18] sm:$0xff] }
  0xbf   : > { %1747 = vmatpush1.bf16.msra.mxu0 %v3663_v12  ;;  %1790 = vmatpush1.bf16.msra.mxu1 %v3666_v47  ;;  %v3728_v12 = vld [vmem:[%s4881_s3 + $0x72c] ss:$24 sps:$4 sm:$0xff]   ;;  %v1952_v47 = vrot.slane %v1950_v9, 1 }
  0xc0   : > { %1748 = vmatprep.subr.bf16.mxu0 %v3671_v19  ;;  %1791 = vmatprep.subr.bf16.mxu1 %v3674_v20  ;;  %v3734_v19 = vld [vmem:[%s4881_s3 + $0x75c] ss:$24 sps:$4 sm:$0xff]   ;;  %v3729_v20 = vld [vmem:[%s4881_s3 + $0x580] ss:$24 sps:$4 sm:$0xff]  }
  0xc1   : > { %v1956_v23 = vor.u32 %v1955_v17, %v1952_v47  ;;  %v2458_v47 = vld [vmem:[%s4882_s4 + $0xa0] sm:$0xff]  ;;  %v2459_v17 = vld [vmem:[%s4882_s4 + $0xa8] sm:$0xff] }
  0xc3   : > { %1749 = vmatpush1.bf16.msra.mxu0 %v3669_v21  ;;  %1792 = vmatpush1.bf16.msra.mxu1 %v3672_v39  ;;  %v3732_v21 = vld [vmem:[%s4881_s3 + $0x758] ss:$24 sps:$4 sm:$0xff]   ;;  %v4586_v39 = vsel %vm1940_vm3, %v1948_v22, %v1956_v23 }
  0xc4   : > { %1816 = vmatprep.subr.bf16.mxu0 %v3677_v28  ;;  %2322 = vmatprep.subr.bf16.mxu1 %v3680_v29  ;;  %v3743_v28 = vld [vmem:[%s4881_s3 + $0x604] ss:$24 sps:$4 sm:$0xff]   ;;  %v3741_v29 = vld [vmem:[%s4881_s3 + $0x600] ss:$24 sps:$4 sm:$0xff]   ;;  %v2460_v22 = vld [vmem:[%s4882_s4 + $0xb0] sm:$0xff] }
  0xc5   : > { %v2461_v23 = vld [vmem:[%s4882_s4 + $0xb8] sm:$0xff] }
  0xc6   : > { %1763 = vmatmul.mubr.bf16.vlgmr.msra.gmra.mrb[4].mxu0 %v4460_v34  ;;  %1806 = vmatmul.mubr.bf16.vlgmr.msra.gmra.mrb[4].mxu1 %v4460_v34 }
  0xc7   : > { %1817 = vmatpush1.bf16.msra.mxu0 %v3675_v30  ;;  %2323 = vmatpush1.bf16.msra.mxu1 %v3678_v33  ;;  %v3746_v30 = vld [vmem:[%s4881_s3 + $0x634] ss:$24 sps:$4 sm:$0xff]   ;;  %v3747_v33 = vld [vmem:[%s4881_s3 + $0x660] ss:$24 sps:$4 sm:$0xff]  }
  0xc8   : > { %1818 = vmatprep.subr.bf16.mxu0 %v3683_v35  ;;  %2324 = vmatprep.subr.bf16.mxu1 %v3686_v36  ;;  %v3750_v35 = vld [vmem:[%s4881_s3 + $0x690] ss:$24 sps:$4 sm:$0xff]   ;;  %v3755_v36 = vld [vmem:[%s4881_s3 + $0x6c4] ss:$24 sps:$4 sm:$0xff]  }
  0xc9   : > { %3209 = vmatprep.mubr.msk.bf16.mxu1 %vm313_vm0, %v4471_v37  ;;  %3087 = vmatprep.mubr.msk.bf16.mxu0 %vm313_vm0, %v4340_v42  ;;  %v3698_v42 = vld [vmem:[%s4881_s3 + $0x63c] ss:$24 sps:$4 sm:$0xff]  }
  0xcb   : > { %1819 = vmatpush1.bf16.msra.mxu0 %v3681_v40  ;;  %2325 = vmatpush1.bf16.msra.mxu1 %v3684_v41  ;;  %v3753_v40 = vld [vmem:[%s4881_s3 + $0x6c0] ss:$24 sps:$4 sm:$0xff]   ;;  %v3758_v41 = vld [vmem:[%s4881_s3 + $0x6f4] ss:$24 sps:$4 sm:$0xff]  }
  0xcc   : > { %1820 = vmatprep.subr.bf16.mxu0 %v3689_v43  ;;  %2326 = vmatprep.subr.bf16.mxu1 %v3692_v44  ;;  %v3756_v43 = vld [vmem:[%s4881_s3 + $0x6f0] ss:$24 sps:$4 sm:$0xff]   ;;  %v3761_v44 = vld [vmem:[%s4881_s3 + $0x724] ss:$24 sps:$4 sm:$0xff]  }
  0xcf   : > { %1821 = vmatpush1.bf16.msra.mxu0 %v3687_v45  ;;  %2327 = vmatpush1.bf16.msra.mxu1 %v3690_v46  ;;  %v3759_v45 = vld [vmem:[%s4881_s3 + $0x720] ss:$24 sps:$4 sm:$0xff]   ;;  %v3764_v46 = vld [vmem:[%s4881_s3 + $0x754] ss:$24 sps:$4 sm:$0xff]  }
  0xd0   : > { %1822 = vmatprep.subr.bf16.mxu0 %v3695_v48  ;;  %2328 = vmatprep.subr.bf16.mxu1 %v3698_v42  ;;  %v3762_v48 = vld [vmem:[%s4881_s3 + $0x750] ss:$24 sps:$4 sm:$0xff]   ;;  %v3767_v42 = vld [vmem:[%s4881_s3 + $0x5b4] ss:$24 sps:$4 sm:$0xff]  }
  0xd3   : > { %1823 = vmatpush1.bf16.msra.mxu0 %v3693_v49  ;;  %2329 = vmatpush1.bf16.msra.mxu1 %v3696_v50  ;;  %v3765_v49 = vld [vmem:[%s4881_s3 + $0x5b0] ss:$24 sps:$4 sm:$0xff]   ;;  %v3770_v50 = vld [vmem:[%s4881_s3 + $0x5e4] ss:$24 sps:$4 sm:$0xff]  }
  0xd4   : > { %1824 = vmatprep.subr.bf16.mxu0 %v3701_v51  ;;  %2330 = vmatprep.subr.bf16.mxu1 %v3704_v52  ;;  %v3768_v51 = vld [vmem:[%s4881_s3 + $0x5e0] ss:$24 sps:$4 sm:$0xff]   ;;  %v3773_v52 = vld [vmem:[%s4881_s3 + $0x614] ss:$24 sps:$4 sm:$0xff]  }
  0xd7   : > { %1825 = vmatpush1.bf16.msra.mxu0 %v3699_v53  ;;  %2331 = vmatpush1.bf16.msra.mxu1 %v3702_v54  ;;  %v3771_v53 = vld [vmem:[%s4881_s3 + $0x610] ss:$24 sps:$4 sm:$0xff]   ;;  %v3776_v54 = vld [vmem:[%s4881_s3 + $0x644] ss:$24 sps:$4 sm:$0xff]  }
  0xd8   : > { %1826 = vmatprep.subr.bf16.mxu0 %v3707_v55  ;;  %2332 = vmatprep.subr.bf16.mxu1 %v3710_v56  ;;  %v3779_v55 = vld [vmem:[%s4881_s3 + $0x674] ss:$24 sps:$4 sm:$0xff]  }
  0xdb   : > { %1827 = vmatpush1.bf16.msra.mxu0 %v3705_v38  ;;  %2333 = vmatpush1.bf16.msra.mxu1 %v3708_v57  ;;  %v3777_v57 = vld [vmem:[%s4881_s3 + $0x670] ss:$24 sps:$4 sm:$0xff]  }
  0xdc   : > { %1828 = vmatprep.subr.bf16.mxu0 %v3713_v58  ;;  %2334 = vmatprep.subr.bf16.mxu1 %v3716_v59  ;;  %v3782_v59 = vld [vmem:[%s4881_s3 + $0x6a4] ss:$24 sps:$4 sm:$0xff]  }
  0xdf   : > { %1829 = vmatpush1.bf16.msra.mxu0 %v3711_v62  ;;  %2335 = vmatpush1.bf16.msra.mxu1 %v3714_v63  ;;  %v3785_v62 = vld [vmem:[%s4881_s3 + $0x6d4] ss:$24 sps:$4 sm:$0xff]   ;;  %v3783_v63 = vld [vmem:[%s4881_s3 + $0x6d0] ss:$24 sps:$4 sm:$0xff]  }
  0xe0   : > { %1830 = vmatprep.subr.bf16.mxu0 %v3719_v3  ;;  %2336 = vmatprep.subr.bf16.mxu1 %v3722_v4  ;;  %v3789_v3 = vld [vmem:[%s4881_s3 + $0x730] ss:$24 sps:$4 sm:$0xff]   ;;  %v3794_v4 = vld [vmem:[%s4881_s3 + $0x764] ss:$24 sps:$4 sm:$0xff]  }
  0xe3   : > { %1831 = vmatpush1.bf16.msra.mxu0 %v3717_v5  ;;  %2337 = vmatpush1.bf16.msra.mxu1 %v3720_v6  ;;  %v3792_v5 = vld [vmem:[%s4881_s3 + $0x760] ss:$24 sps:$4 sm:$0xff]  }
  0xe4   : > { %1832 = vmatprep.subr.bf16.mxu0 %v3725_v11  ;;  %2338 = vmatprep.subr.bf16.mxu1 %v3728_v12  ;;  %v2454_v6 = vld [vmem:[%s4882_s4 + $0x80] sm:$0xff]  ;;  %v2456_v11 = vld [vmem:[%s4882_s4 + $0x90] sm:$0xff]  ;;  %v2457_v12 = vld [vmem:[%s4882_s4 + $0x98] sm:$0xff] }
  0xe5   : > { %v3309_v9 = vpack.c.bf16 %v2455_v7, %v2454_v6 }
  0xe7   : > { %1833 = vmatpush1.bf16.msra.mxu0 %v3723_v13  ;;  %2339 = vmatpush1.bf16.msra.mxu1 %v3726_v14  ;;  %v3311_v13 = vpack.c.bf16 %v2439_v10, %v2438_v8  ;;  %v3313_v14 = vpack.c.bf16 %v2457_v12, %v2456_v11 }
  0xe8   : > { %1834 = vmatprep.subr.bf16.mxu0 %v3731_v18  ;;  %2340 = vmatprep.subr.bf16.mxu1 %v3734_v19  ;;  %v3315_v18 = vpack.c.bf16 %v2441_v16, %v2440_v15  ;;  %v3317_v19 = vpack.c.bf16 %v2459_v17, %v2458_v47 }
  0xeb   : > { %1835 = vmatpush1.bf16.msra.mxu0 %v3729_v20  ;;  %2341 = vmatpush1.bf16.msra.mxu1 %v3732_v21  ;;  %v2442_v20 = vld [vmem:[%s4882_s4 + $0x20] sm:$0xff]  ;;  %v2443_v21 = vld [vmem:[%s4882_s4 + $0x28] sm:$0xff] }
  0xec   : > { %2279 = vmatprep.subr.bf16.mxu0 %v3737_v24  ;;  %3310 = vmatprep.subr.bf16.mxu1 %v3309_v9  ;;  %v3319_v24 = vpack.c.bf16 %v2443_v21, %v2442_v20 }
  0xee   : > { %2355 = vmatmul.mubr.bf16.vlgmr.msra.gmra.mrb[4].mxu1 %v4586_v39  ;;  %1849 = vmatmul.mubr.bf16.vlgmr.msra.gmra.mrb[0].mxu0 %v4460_v34  ;;  %v3752_v34 = vld [vmem:[%s4881_s3 + $0x694] ss:$24 sps:$4 sm:$0xff]  }
  0xef   : > { %2280 = vmatpush1.bf16.msra.mxu0 %v3735_v25  ;;  %3208 = vmatprep.mubr.msk.bf16.mxu0 %vm313_vm0, %v4471_v37  ;;  %v3321_v25 = vpack.c.bf16 %v2461_v23, %v2460_v22 }
  0xf0   : > { %2281 = vmatprep.subr.bf16.mxu0 %v3740_v26  ;;  %3312 = vmatpush3.bf16.msra.mxu1 %v3311_v13  ;;  %v2445_v26 = vld [vmem:[%s4882_s4 + $0x38] sm:$0xff] }
  0xf1   : > { %3314 = vmatprep.subr.bf16.mxu1 %v3313_v14 }
  0xf3   : > { %2282 = vmatpush1.bf16.msra.mxu0 %v3738_v27  ;;  %v2462_v27 = vld [vmem:[%s4882_s4 + $0xc0] sm:$0xff] }
  0xf4   : > { %2283 = vmatprep.subr.bf16.mxu0 %v3743_v28  ;;  %3316 = vmatpush3.bf16.msra.mxu1 %v3315_v18  ;;  %v2463_v28 = vld [vmem:[%s4882_s4 + $0xc8] sm:$0xff] }
  0xf5   : > { %3318 = vmatprep.subr.bf16.mxu1 %v3317_v19 }
  0xf7   : > { %2284 = vmatpush1.bf16.msra.mxu0 %v3741_v29 }
  0xf8   : > { %2285 = vmatprep.subr.bf16.mxu0 %v3746_v30  ;;  %3320 = vmatpush3.bf16.msra.mxu1 %v3319_v24  ;;  %v3325_v30 = vpack.c.bf16 %v2463_v28, %v2462_v27  ;;  %v2474_v27 = vld [vmem:[%s4882_s4 + $0x120] sm:$0xff]  ;;  %v2475_v28 = vld [vmem:[%s4882_s4 + $0x128] sm:$0xff] }
  0xf9   : > { %3322 = vmatprep.subr.bf16.mxu1 %v3321_v25 }
  0xfb   : > { %2286 = vmatpush1.bf16.msra.mxu0 %v3744_v31  ;;  %v2446_v31 = vld [vmem:[%s4882_s4 + $0x40] sm:$0xff] }
  0xfc   : > { %2287 = vmatprep.subr.bf16.mxu0 %v3749_v32  ;;  %v2447_v32 = vld [vmem:[%s4882_s4 + $0x48] sm:$0xff] }
  0xff   : > { %2288 = vmatpush1.bf16.msra.mxu0 %v3747_v33  ;;  %v2464_v33 = vld [vmem:[%s4882_s4 + $0xd0] sm:$0xff] }
 0x100   : > { %2289 = vmatprep.subr.bf16.mxu0 %v3752_v34  ;;  %v2465_v34 = vld [vmem:[%s4882_s4 + $0xd8] sm:$0xff] }
 0x103   : > { %2290 = vmatpush1.bf16.msra.mxu0 %v3750_v35  ;;  %v3327_v35 = vpack.c.bf16 %v2447_v32, %v2446_v31  ;;  %v2476_v31 = vld [vmem:[%s4882_s4 + $0x130] sm:$0xff]  ;;  %v2477_v32 = vld [vmem:[%s4882_s4 + $0x138] sm:$0xff] }
 0x104   : > { %2291 = vmatprep.subr.bf16.mxu0 %v3755_v36  ;;  %v3329_v36 = vpack.c.bf16 %v2465_v34, %v2464_v33  ;;  %v3353_v33 = vpack.c.bf16 %v2477_v32, %v2476_v31  ;;  %v2478_v34 = vld [vmem:[%s4882_s4 + $0x140] sm:$0xff] }
 0x107   : > { %2292 = vmatpush1.bf16.msra.mxu0 %v3753_v40  ;;  %v2448_v40 = vld [vmem:[%s4882_s4 + $0x50] sm:$0xff] }
 0x108   : > { %2293 = vmatprep.subr.bf16.mxu0 %v3758_v41  ;;  %v2449_v41 = vld [vmem:[%s4882_s4 + $0x58] sm:$0xff] }
 0x10b   : > { %2294 = vmatpush1.bf16.msra.mxu0 %v3756_v43  ;;  %v2466_v43 = vld [vmem:[%s4882_s4 + $0xe0] sm:$0xff] }
 0x10c   : > { %2295 = vmatprep.subr.bf16.mxu0 %v3761_v44  ;;  %v2467_v44 = vld [vmem:[%s4882_s4 + $0xe8] sm:$0xff] }
 0x10f   : > { %2296 = vmatpush1.bf16.msra.mxu0 %v3759_v45  ;;  %v3331_v45 = vpack.c.bf16 %v2449_v41, %v2448_v40  ;;  %v2480_v40 = vld [vmem:[%s4882_s4 + $0x150] sm:$0xff]  ;;  %v2481_v41 = vld [vmem:[%s4882_s4 + $0x158] sm:$0xff] }
 0x110   : > { %2297 = vmatprep.subr.bf16.mxu0 %v3764_v46  ;;  %v3333_v46 = vpack.c.bf16 %v2467_v44, %v2466_v43  ;;  %v3361_v43 = vpack.c.bf16 %v2481_v41, %v2480_v40  ;;  %v2482_v44 = vld [vmem:[%s4882_s4 + $0x160] sm:$0xff] }
 0x113   : > { %2298 = vmatpush1.bf16.msra.mxu0 %v3762_v48  ;;  %v2450_v48 = vld [vmem:[%s4882_s4 + $0x60] sm:$0xff] }
 0x114   : > { %2365 = vmatprep.subr.bf16.mxu0 %v3767_v42  ;;  %v2451_v42 = vld [vmem:[%s4882_s4 + $0x68] sm:$0xff] }
 0x116   : > { %2312 = vmatmul.mubr.bf16.vlgmr.msra.gmra.mrb[4].mxu0 %v4586_v39 }
 0x117   : > { %2366 = vmatpush1.bf16.msra.mxu0 %v3765_v49  ;;  %3210 = vmatprep.mubr.msk.bf16.mxu0 %vm313_vm0, %v4471_v37  ;;  %v3774_v37 = vld [vmem:[%s4881_s3 + $0x640] ss:$24 sps:$4 sm:$0xff]   ;;  %v3335_v49 = vpack.c.bf16 %v2451_v42, %v2450_v48  ;;  %v2484_v48 = vld [vmem:[%s4882_s4 + $0x170] sm:$0xff] }
 0x118   : > { %2367 = vmatprep.subr.bf16.mxu0 %v3770_v50  ;;  %v2468_v50 = vld [vmem:[%s4882_s4 + $0xf0] sm:$0xff]  ;;  %v2485_v42 = vld [vmem:[%s4882_s4 + $0x178] sm:$0xff] }
 0x11b   : > { %2368 = vmatpush1.bf16.msra.mxu0 %v3768_v51  ;;  %v2469_v51 = vld [vmem:[%s4882_s4 + $0xf8] sm:$0xff] }
 0x11c   : > { %2369 = vmatprep.subr.bf16.mxu0 %v3773_v52  ;;  %v3337_v52 = vpack.c.bf16 %v2469_v51, %v2468_v50 }
 0x11f   : > { %2370 = vmatpush1.bf16.msra.mxu0 %v3771_v53  ;;  %v2452_v53 = vld [vmem:[%s4882_s4 + $0x70] sm:$0xff] }
 0x120   : > { %2371 = vmatprep.subr.bf16.mxu0 %v3776_v54  ;;  %v2453_v54 = vld [vmem:[%s4882_s4 + $0x78] sm:$0xff] }
 0x121   : > { %v4676_v56 = vpop.f32.mrb[0].mxu1 }
 0x122   : > { %v4678_v38 = vpop.f32.mrb[1].mxu1 }
 0x123   : > { %2372 = vmatpush1.bf16.msra.mxu0 %v3774_v37  ;;  %v4683_v58 = vpop.f32.mrb[2].mxu1  ;;  %v3339_v37 = vpack.c.bf16 %v2453_v54, %v2452_v53 }
 0x124   : > { %2373 = vmatprep.subr.bf16.mxu0 %v3779_v55  ;;  %v4688_v60 = vpop.f32.mrb[3].mxu1  ;;  %v2470_v55 = vld [vmem:[%s4882_s4 + $0x100] sm:$0xff] }
 0x127   : > { %2374 = vmatpush1.bf16.msra.mxu0 %v3777_v57  ;;  %v2471_v57 = vld [vmem:[%s4882_s4 + $0x108] sm:$0xff] }
 0x128   : > { %2375 = vmatprep.subr.bf16.mxu0 %v3782_v59  ;;  %v3341_v59 = vpack.c.bf16 %v2471_v57, %v2470_v55 }
 0x12b   : > { %2376 = vmatpush1.bf16.msra.mxu0 %v3780_v61 }
 0x12c   : > { %2377 = vmatprep.subr.bf16.mxu0 %v3785_v62 }
 0x12f   : > { %2378 = vmatpush1.bf16.msra.mxu0 %v3783_v63 }
 0x130   : > { %2379 = vmatprep.subr.bf16.mxu0 %v3788_v0 }
 0x133   : > { %2380 = vmatpush1.bf16.msra.mxu0 %v3786_v1 }
 0x134   : > { %2381 = vmatprep.subr.bf16.mxu0 %v3791_v2 }
 0x137   : > { %2382 = vmatpush1.bf16.msra.mxu0 %v3789_v3 }
 0x138   : > { %2383 = vmatprep.subr.bf16.mxu0 %v3794_v4 }
 0x13b   : > { %2384 = vmatpush1.bf16.msra.mxu0 %v3792_v5 }
 0x13e   : > { %2398 = vmatmul.mubr.bf16.vlgmr.msra.gmra.mrb[0].mxu0 %v4586_v39  ;;  %v2444_v39 = vld [vmem:[%s4882_s4 + $0x30] sm:$0xff] }
 0x13f   : > { %v3323_v29 = vpack.c.bf16 %v2445_v26, %v2444_v39 }
 0x141   : > { %3324 = vmatpush3.bf16.msra.mxu1 %v3323_v29 }
 0x142   : > { %3326 = vmatprep.subr.bf16.mxu1 %v3325_v30  ;;  %v3349_v30 = vpack.c.bf16 %v2475_v28, %v2474_v27 }
 0x145   : > { %3328 = vmatpush3.bf16.msra.mxu1 %v3327_v35  ;;  %v2479_v35 = vld [vmem:[%s4882_s4 + $0x148] sm:$0xff] }
 0x146   : > { %3330 = vmatprep.subr.bf16.mxu1 %v3329_v36  ;;  %v3357_v36 = vpack.c.bf16 %v2479_v35, %v2478_v34 }
 0x149   : > { %3332 = vmatpush3.bf16.msra.mxu1 %v3331_v45  ;;  %v2483_v45 = vld [vmem:[%s4882_s4 + $0x168] sm:$0xff] }
 0x14a   : > { %3334 = vmatprep.subr.bf16.mxu1 %v3333_v46  ;;  %v3365_v46 = vpack.c.bf16 %v2483_v45, %v2482_v44 }
 0x14d   : > { %3336 = vmatpush3.bf16.msra.mxu1 %v3335_v49  ;;  %v3369_v49 = vpack.c.bf16 %v2485_v42, %v2484_v48 }
 0x14e   : > { %3338 = vmatprep.subr.bf16.mxu1 %v3337_v52 }
 0x151   : > { %3340 = vmatpush3.bf16.msra.mxu1 %v3339_v37 }
 0x152   : > { %3342 = vmatprep.subr.bf16.mxu1 %v3341_v59 }
 0x1c1   : > { %v2356_v61 = vpop.f32.mrb[4].mxu1 }
 0x1c2   : > { %v2358_v62 = vpop.f32.mrb[5].mxu1 }
 0x1c3   : > { %v2360_v63 = vpop.f32.mrb[6].mxu1  ;;  %v2426_v6 = vmul.f32 %v2358_v62, %v2358_v62  ;;  %v2640_v62 = vlaneseq }
 0x1c4   : > { %v2362_v0 = vpop.f32.mrb[7].mxu1  ;;  %v2425_v23 = vmul.f32 %v2360_v63, %v2360_v63 }
 0x1c5   : > { %v2429_v11 = vmul.f32 %v2362_v0, %v2362_v0 }
 0x1e9   : > { %v2313_v1 = vpop.f32.mrb[4].mxu0 }
 0x1ea   : > { %v3373_v2 = vadd.f32 %v2313_v1, %v4676_v56  ;;  %v2315_v3 = vpop.f32.mrb[5].mxu0  ;;  %v2472_v56 = vld [vmem:[%s4882_s4 + $0x110] sm:$0xff]  ;;  %v2641_v1 = vshrl.u32 %v2640_v62, 7 }
 0x1eb   : > { %v3374_v4 = vadd.f32 %v2315_v3, %v4678_v38  ;;  %v2317_v5 = vpop.f32.mrb[6].mxu0  ;;  %v2473_v38 = vld [vmem:[%s4882_s4 + $0x118] sm:$0xff]  ;;  %v2646_v3 = vstv %s3891_s26 }
 0x1ec   : > { %v2420_v7 = vmul.f32 %v3373_v2, %v3373_v2  ;;  %v3375_v8 = vadd.f32 %v2317_v5, %v4683_v58  ;;  %v2319_v9 = vpop.f32.mrb[7].mxu0  ;;  %v2422_v58 = vmul.f32 %v2356_v61, %v2356_v61  ;;  %v3345_v39 = vpack.c.bf16 %v2473_v38, %v2472_v56 }
 0x1ed   : > { %v3376_v10 = vadd.f32 %v2319_v9, %v4688_v60  ;;  %v2421_v16 = vmul.f32 %v3374_v4, %v3374_v4  ;;  %v2642_v2 = vadd.s32 8, %v2641_v1  ;;  %vm2647_vm5 = vcmp.ge.s32.totalorder %v2641_v1, %v2646_v3 }
 0x1ee   : > { %v2432_v12 = vadd.f32 %v2426_v6, %v2420_v7  ;;  %v2423_v13 = vmul.f32 %v3375_v8, %v3375_v8 }
 0x1ef   : > { %v2424_v60 = vmul.f32 %v3376_v10, %v3376_v10  ;;  %vm2648_vm4 = vcmp.ge.s32.totalorder %v2642_v2, %v2646_v3 }
 0x1f0   : > { %v2435_v14 = vadd.f32 %v2429_v11, %v2423_v13 }
 0x211   : > { %v2399_v15 = vpop.f32.mrb[0].mxu0 }
 0x212   : > { %v2427_v47 = vmul.f32 %v2399_v15, %v2399_v15  ;;  %v2401_v17 = vpop.f32.mrb[1].mxu0 }
 0x213   : > { %v2428_v18 = vmul.f32 %v2401_v17, %v2401_v17  ;;  %v2403_v19 = vpop.f32.mrb[2].mxu0 }
 0x214   : > { %v2433_v20 = vadd.f32 %v2427_v47, %v2421_v16  ;;  %v2430_v21 = vmul.f32 %v2403_v19, %v2403_v19  ;;  %v2405_v22 = vpop.f32.mrb[3].mxu0 }
 0x215   : > { %v2434_v24 = vadd.f32 %v2428_v18, %v2422_v58  ;;  %v2431_v25 = vmul.f32 %v2405_v22, %v2405_v22 }
 0x216   : > { %v2436_v26 = vadd.f32 %v2430_v21, %v2424_v60  ;;  %2550 = vmatprep.mubr.f32.mxu1 %v2433_v20 }
 0x217   : > { %v2437_v29 = vadd.f32 %v2431_v25, %v2425_v23  ;;  %2551 = vmatmul.mubr.f32.vlgmr.msra.gmra.mrb[8].mxu1 %v2432_v12 }
 0x218   : > { %3344 = vmatpush3.bf16.msra.mxu1 %v3341_v59  ;;  %2555 = vmatprep.mubr.f32.mxu1 %v2436_v26 }
 0x219   : > { %3346 = vmatprep.subr.bf16.mxu1 %v3345_v39 }
 0x21b   : > { %2556 = vmatmul.mubr.f32.gmra.mrb[10].mxu1 %v2435_v14 }
 0x21c   : > { %3348 = vmatpush3.bf16.msra.mxu1 %v3345_v39  ;;  %3306 = vmatprep.mubr.f32.mxu1 %v2434_v24 }
 0x21d   : > { %3350 = vmatprep.subr.bf16.mxu1 %v3349_v30 }
 0x220   : > { %3352 = vmatpush3.bf16.msra.mxu1 %v3349_v30 }
 0x221   : > { %3354 = vmatprep.subr.bf16.mxu1 %v3353_v33 }
 0x224   : > { %3356 = vmatpush3.bf16.msra.mxu1 %v3353_v33 }
 0x225   : > { %3358 = vmatprep.subr.bf16.mxu1 %v3357_v36 }
 0x228   : > { %3360 = vmatpush3.bf16.msra.mxu1 %v3357_v36 }
 0x229   : > { %3362 = vmatprep.subr.bf16.mxu1 %v3361_v43 }
 0x22c   : > { %3364 = vmatpush3.bf16.msra.mxu1 %v3361_v43 }
 0x22d   : > { %3366 = vmatprep.subr.bf16.mxu1 %v3365_v46 }
 0x230   : > { %3368 = vmatpush3.bf16.msra.mxu1 %v3365_v46 }
 0x231   : > { %3370 = vmatprep.subr.bf16.mxu1 %v3369_v49 }
 0x234   : > { %3372 = vmatpush3.bf16.msra.mxu1 %v3369_v49 }
 0x237   : > { %3307 = vmatmul.mubr.f32.vlgmr.msra.gmra.mrb[12].mxu1 %v2437_v29 }
 0x2ea   : > { %v3250_v50 = vpop.f32.mrb[8].mxu1 }
 0x2eb   : > { %v3251_v51 = vpop.f32.mrb[9].mxu1 }
 0x2ec   : > { %v3252_v52 = vadd.f32 %v3251_v51, %v3250_v50 }
 0x2ee   : > { %v3253_v53 = vpop.f32.mrb[10].mxu1  ;;  %v2553_v57 = vadd.f32 5.9604645e-08, %v3252_v52 }
 0x2ef   : > { %v3254_v54 = vpop.f32.mrb[11].mxu1 }
 0x2f0   : > { %v3255_v37 = vadd.f32 %v3254_v54, %v3253_v53 }
 0x2f2   : > { %v2558_v55 = vadd.f32 5.9604645e-08, %v3255_v37 }
 0x30a   : > { %v3308_v59 = vpop.f32.mrb[12].mxu1 }
 0x30b   : > { %v2633_v61 = vadd.f32 %v3308_v59, %v2558_v55  ;;  %v2627_v63 = vpop.f32.mrb[13].mxu1 }
 0x30c   : > { %v2628_v0 = vadd.f32 %v2627_v63, %v2553_v57 }
 0x30d   : > { %3795 = vlog2.f32 %v2633_v61 }
 0x30e   : > { %3797 = vlog2.f32 %v2628_v0 }
 0x317   : > { %v3796_v4 = vpop.eup %3795 }
 0x318   : > { %v3798_v5 = vpop.eup %3797  ;;  %v2639_v6 = vmul.f32 0.6931472, %v3796_v4 }
 0x319   : > { %v2637_v7 = vmul.f32 0.6931472, %v3798_v5 }
 0x31a   : > { %v2650_v8 = vsel %vm2648_vm4, 0.0, %v2639_v6 }
 0x31b   : > { %2652 = vst [vmem:[%s3906_s13 + $0x8] sm:$0xff] %v2650_v8  ;;  %v2649_v9 = vsel %vm2647_vm5, 0.0, %v2637_v7 }
 0x31c   : > { %2651 = vst [vmem:[%s3906_s13] sm:$0xff] %v2649_v9 }
 0x31d PF: > { %s21_s25 = sadd.s32 1, %s3836_s25   ;;  %s4884_s23 = smov %s3832_s24 }
 0x31e   : > { %p18_p12 = scmp.ge.s32.totalorder %s21_s25, 4   ;;  %s4885_s24 = smov %s4887_s0 }
 0x320   :  { %20 = sbr.rel (!%p18_p12) target bundleno = 17 (0x11), region = 80 }

</bundles_post_ra>
